<compile_context>
chip_gen: v7x
topology: tpu7x:2x2x1
jax: 0.10.0
libtpu: 0.0.40
codegen_flags: <defaults>
</compile_context>

<pallas_src>
import numpy as np
import jax
import jax.numpy as jnp
from jax import lax
from jax.experimental import pallas as pl
from jax.experimental.pallas import tpu as pltpu


# Anti-alias blur filter used by `downsamp` (filt_size=3): ([1,2,1] x [1,2,1]) / 16
_BLUR1D = np.array([1.0, 2.0, 1.0], dtype=np.float32)
_BLUR2D = _BLUR1D[:, None] * _BLUR1D[None, :]
_BLUR2D = _BLUR2D / _BLUR2D.sum()

# 3x3 tap offsets, ordered to match weight layout (kh, kw) = (dy+1, dx+1)
_TAPS = tuple((dy, dx) for dy in (-1, 0, 1) for dx in (-1, 0, 1))


def _blur_down_matrix(n):
    """1-D operator S (n, n//2): v @ S == reflect-pad-1 [1,2,1]/4 conv with stride 2."""
    no = (n - 1) // 2 + 1
    taps = np.array([0.25, 0.5, 0.25], dtype=np.float32)
    S = np.zeros((n, no), dtype=np.float32)
    for i in range(no):
        for t in range(3):
            k = 2 * i + t - 1
            if k < 0:
                k = -k                      # reflect pad (left)
            if k >= n:
                k = 2 * (n - 1) - k         # reflect pad (right)
            S[k, i] += taps[t]
    return S


# ------------------------------ fused kernel --------------------------------

def _prelu(v, a):
    return jnp.where(v >= 0, v, a * v)


def _spatial_coords(L, H, W):
    """Per-lane (row, col) coordinates of the flat (batch, H, W) lane axis (VPU only)."""
    lane = lax.broadcasted_iota(jnp.int32, (1, L), 1)
    if (H & (H - 1)) == 0 and (W & (W - 1)) == 0:
        px = lane & (W - 1)                       # bit ops: no vector int div needed
        py = (lane >> int(np.log2(W))) & (H - 1)
    else:
        # TODO(synk): non-power-of-2 spatial sizes rely on vector int div/mod lowering.
        pix = lane % (H * W)
        py = pix // W
        px = pix % W
    return py, px


def _make_fused_kernel(level_shapes, nb):
    """level_shapes: list of (C, H, W), one per ResidualDownSample level; nb images/step."""
    n_lvl = len(level_shapes)

    def kernel(*refs):
        x_ref = refs[0]
        w_refs = refs[1:1 + 5 * n_lvl]
        alpha_ref = refs[1 + 5 * n_lvl]           # SMEM, (2 * n_lvl,)
        o_ref = refs[2 + 5 * n_lvl]

        xf = x_ref[...]                           # (C0, nb*H0*W0) channels-first, flat lanes
        for l, (C, H, W) in enumerate(level_shapes):
            L = nb * H * W
            w1 = w_refs[5 * l + 0][...]           # (C, C)        1x1 conv
            w3_ref = w_refs[5 * l + 1]            # (9, C, C)     3x3 conv, per-tap weights
            wt = w_refs[5 * l + 2][...]           # (2C, C)       top output 1x1 conv
            wb = w_refs[5 * l + 3][...]           # (2C, C)       bot output 1x1 conv
            d = w_refs[5 * l + 4][...]            # (L, Lo)       block-diag blur-down op
            a1 = alpha_ref[2 * l]
            a2 = alpha_ref[2 * l + 1]

            # --- top: 1x1 conv + PReLU (lane dim = L >= 128, dense)
            y1 = _prelu(jnp.dot(w1, xf, preferred_element_type=jnp.float32), a1)

            # --- top: 3x3 conv (zero pad=1) + PReLU via 9 lane-rolls + boundary masks.
            #     No padded scratch, no im2col concat, no lane re-gather.
            py, px = _spatial_coords(L, H, W)
            acc = None
            for t, (dy, dx) in enumerate(_TAPS):
                off = dy * W + dx
                sh = y1 if off == 0 else pltpu.roll(y1, shift=(-off) % L, axis=1)
                conds = []
                if dy < 0:
                    conds.append(py >= -dy)
                if dy > 0:
                    conds.append(py < H - dy)
                if dx < 0:
                    conds.append(px >= -dx)
                if dx > 0:
                    conds.append(px < W - dx)
                if conds:
                    valid = conds[0]
                    for cnd in conds[1:]:
                        valid = valid & cnd
                    sh = jnp.where(valid, sh, 0.0)
                term = jnp.dot(w3_ref[t], sh, preferred_element_type=jnp.float32)
                acc = term if acc is None else acc + term
            y2 = _prelu(acc, a2)

            # --- blur-downsample BOTH paths (two K=L matmuls against the block-diagonal
            #     blur operator), then the two output 1x1 convs + residual add.
            #     (No sublane concat; MXU has plenty of slack for the extra tiny pushes.)
            zt = jnp.dot(y2, d, preferred_element_type=jnp.float32)        # (C, Lo)
            zb = jnp.dot(xf, d, preferred_element_type=jnp.float32)        # (C, Lo)
            xf = (jnp.dot(wt, zt, preferred_element_type=jnp.float32)
                  + jnp.dot(wb, zb, preferred_element_type=jnp.float32))   # (2C, Lo)

        o_ref[...] = xf                           # natural lane-dense slab, no reshape

    return kernel


# -------------------------------- wrapper ------------------------------------

def downsample_forward(x_nchw, packed):
    """x_nchw: (N, C, H, W) float32 (PyTorch layout). Returns (N, C*2^L, H/2^L, W/2^L)."""
    N, C, H, W = x_nchw.shape
    levels = packed["levels"]
    alphas = packed["alphas"]
    n_lvl = len(levels)

    level_shapes = []
    c, h, w = C, H, W
    for _ in range(n_lvl):
        level_shapes.append((c, h, w))
        c, h, w = 2 * c, h // 2, w // 2
    C_out, Ho, Wo = c, h, w

    # images folded into the lane axis per grid step (derived from how D was packed)
    nb = levels[0]["D"].shape[0] // (H * W)
    assert N % nb == 0, (N, nb)
    grid = (N // nb,)

    # (N, C, H, W) -> (C, N*H*W): channels on sublanes, batch folded into lanes (b-major)
    x2 = jnp.transpose(x_nchw, (1, 0, 2, 3)).reshape(C, N * H * W).astype(jnp.float32)

    in_specs = [pl.BlockSpec((C, nb * H * W), lambda b: (0, b))]
    args = [x2]
    for lvl in levels:
        for name in ("W1", "W3", "Wtop", "Wbot", "D"):
            a = lvl[name]
            in_specs.append(pl.BlockSpec(a.shape, lambda b, nd=a.ndim: (0,) * nd))
            args.append(a)
    in_specs.append(pl.BlockSpec(memory_space=pltpu.MemorySpace.SMEM))
    args.append(alphas)

    out = pl.pallas_call(
        _make_fused_kernel(level_shapes, nb),
        out_shape=jax.ShapeDtypeStruct((C_out, N * Ho * Wo), jnp.float32),
        grid=grid,
        in_specs=in_specs,
        out_specs=pl.BlockSpec((C_out, nb * Ho * Wo), lambda b: (0, b)),
        compiler_params=pltpu.CompilerParams(
            dimension_semantics=("parallel",)),
    )(*args)

    # (C_out, N*Ho*Wo) -> (N, C_out, Ho, Wo): cheap host-side layout plumbing
    return jnp.transpose(out.reshape(C_out, N, Ho, Wo), (1, 0, 2, 3))


# --------------------------- parameters (PyTorch layout) ---------------------

def init_residual_params(key, C):
    k1, k2, k3, k4 = jax.random.split(key, 4)
    return {
        "w_top1": jax.random.normal(k1, (C, C), jnp.float32) * 0.1,        # (Cout, Cin)
        "a1": 0.25,                                                        # PReLU init
        "w_top3": jax.random.normal(k2, (C, C, 3, 3), jnp.float32) * 0.1,  # (Cout, Cin, kh, kw)
        "a2": 0.25,
        "w_top_out": jax.random.normal(k3, (2 * C, C), jnp.float32) * 0.1,
        "w_bot_out": jax.random.normal(k4, (2 * C, C), jnp.float32) * 0.1,
    }


def init_downsample_params(key, in_channels, scale_factor, stride=2):
    n_levels = int(np.log2(scale_factor))
    params, C = [], in_channels
    for _ in range(n_levels):
        key, sub = jax.random.split(key)
        params.append(init_residual_params(sub, C))
        C = int(C * stride)
    return params


def pack_params(params, in_channels, H, W, batch):
    """Repack PyTorch-layout weights into the fused-kernel layout (host-side, once).

    `batch` = number of images folded into the lane axis per grid step (nb)."""
    levels, alphas = [], []
    C, h, w = in_channels, H, W
    eye_b = np.eye(batch, dtype=np.float32)
    for p in params:
        D = np.kron(_blur_down_matrix(h), _blur_down_matrix(w))          # (h*w, ho*wo)
        Dblk = np.kron(eye_b, D)                                         # (nb*h*w, nb*ho*wo)
        w3 = np.asarray(p["w_top3"], dtype=np.float32)                   # (C, C, 3, 3)
        w3taps = np.ascontiguousarray(
            np.transpose(w3, (2, 3, 0, 1))).reshape(9, C, C)             # [tap, out, in]
        levels.append({
            "W1": jnp.asarray(p["w_top1"], jnp.float32),
            "W3": jnp.asarray(w3taps, jnp.float32),
            "Wtop": jnp.asarray(p["w_top_out"], jnp.float32),
            "Wbot": jnp.asarray(p["w_bot_out"], jnp.float32),
            "D": jnp.asarray(Dblk, jnp.float32),
        })
        alphas += [p["a1"], p["a2"]]
        C, h, w = 2 * C, h // 2, w // 2
    return {"levels": levels, "alphas": jnp.asarray(alphas, jnp.float32)}


# ------------------------- pure-JAX reference (NCHW) -------------------------

def _ref_forward(x, params):
    def prelu(v, a):
        return jnp.where(v >= 0, v, a * v)

    def conv1x1(v, wmat):
        return jnp.einsum("nchw,oc->nohw", v, wmat)

    def blur_down(v):
        Cc = v.shape[1]
        vp = jnp.pad(v, ((0, 0), (0, 0), (1, 1), (1, 1)), mode="reflect")
        wb = jnp.broadcast_to(jnp.asarray(_BLUR2D)[None, None], (Cc, 1, 3, 3))
        return lax.conv_general_dilated(
            vp, wb, (2, 2), "VALID",
            dimension_numbers=("NCHW", "OIHW", "NCHW"), feature_group_count=Cc)

    for p in params:
        y = prelu(conv1x1(x, p["w_top1"]), p["a1"])
        yp = jnp.pad(y, ((0, 0), (0, 0), (1, 1), (1, 1)))
        y = lax.conv_general_dilated(
            yp, p["w_top3"], (1, 1), "VALID",
            dimension_numbers=("NCHW", "OIHW", "NCHW"))
        y = prelu(y, p["a2"])
        top = conv1x1(blur_down(y), p["w_top_out"])
        bot = conv1x1(blur_down(x), p["w_bot_out"])
        x = top + bot
    return x


# ---------------------------------- main -------------------------------------

if __name__ == "__main__":
    key = jax.random.PRNGKey(0)
    kx, kp = jax.random.split(key)

    N, C, H, W = 2, 4, 16, 16
    scale_factor = 4   # log2 -> 2 ResidualDownSample levels: C 4->8->16, HW 16->8->4

    x = jax.random.normal(kx, (N, C, H, W), jnp.float32)
    params = init_downsample_params(kp, C, scale_factor)
    # Fold the whole batch into the lane axis (nb=N -> grid=(1,)); on v7x with larger N,
    # pack with batch=N//2 to get a 2-step grid across both TensorCores.
    packed = pack_params(params, C, H, W, batch=N)

    fwd = jax.jit(downsample_forward)
    out = jax.block_until_ready(fwd(x, packed))
    assert out.shape == (N, C * scale_factor, H // scale_factor, W // scale_factor), out.shape

    # correctness check against a pure-JAX (lax.conv) reference
    ref = _ref_forward(x, params)
    np.testing.assert_allclose(np.asarray(out), np.asarray(ref), rtol=1e-3, atol=1e-3)

    print("KERNEL_OK")
</pallas_src>

<mosaic_0001>
module attributes {stable_mosaic.version = 11 : i64} {
  func.func @kernel(%arg0: i32, %arg1: memref<4x512xf32, #tpu.memory_space<vmem>>, %arg2: memref<4x4xf32, #tpu.memory_space<vmem>>, %arg3: memref<9x4x4xf32, #tpu.memory_space<vmem>>, %arg4: memref<8x4xf32, #tpu.memory_space<vmem>>, %arg5: memref<8x4xf32, #tpu.memory_space<vmem>>, %arg6: memref<512x128xf32, #tpu.memory_space<vmem>>, %arg7: memref<8x8xf32, #tpu.memory_space<vmem>>, %arg8: memref<9x8x8xf32, #tpu.memory_space<vmem>>, %arg9: memref<16x8xf32, #tpu.memory_space<vmem>>, %arg10: memref<16x8xf32, #tpu.memory_space<vmem>>, %arg11: memref<128x32xf32, #tpu.memory_space<vmem>>, %arg12: memref<4xf32, #tpu.memory_space<smem>>, %arg13: memref<16x32xf32, #tpu.memory_space<vmem>>) attributes {dimension_semantics = [#tpu.dimension_semantics<parallel>], iteration_bounds = array<i64: 1>, scalar_prefetch = 0 : i64, scratch_operands = 0 : i64, tpu.core_type = #tpu.core_type<tc>, window_params = [{transform_indices = @transform_0, window_bounds = array<i64: 4, 512>}, {pipeline_mode = #tpu.pipeline_mode<synchronous>, transform_indices = @transform_1, window_bounds = array<i64: 4, 4>}, {pipeline_mode = #tpu.pipeline_mode<synchronous>, transform_indices = @transform_2, window_bounds = array<i64: 9, 4, 4>}, {pipeline_mode = #tpu.pipeline_mode<synchronous>, transform_indices = @transform_3, window_bounds = array<i64: 8, 4>}, {pipeline_mode = #tpu.pipeline_mode<synchronous>, transform_indices = @transform_4, window_bounds = array<i64: 8, 4>}, {pipeline_mode = #tpu.pipeline_mode<synchronous>, transform_indices = @transform_5, window_bounds = array<i64: 512, 128>}, {pipeline_mode = #tpu.pipeline_mode<synchronous>, transform_indices = @transform_6, window_bounds = array<i64: 8, 8>}, {pipeline_mode = #tpu.pipeline_mode<synchronous>, transform_indices = @transform_7, window_bounds = array<i64: 9, 8, 8>}, {pipeline_mode = #tpu.pipeline_mode<synchronous>, transform_indices = @transform_8, window_bounds = array<i64: 16, 8>}, {pipeline_mode = #tpu.pipeline_mode<synchronous>, transform_indices = @transform_9, window_bounds = array<i64: 16, 8>}, {pipeline_mode = #tpu.pipeline_mode<synchronous>, transform_indices = @transform_10, window_bounds = array<i64: 128, 32>}, {transform_indices = @transform_11, window_bounds = array<i64: 4>}, {transform_indices = @transform_12, window_bounds = array<i64: 16, 32>}]} {
    %c0 = arith.constant 0 : index
    %c0_0 = arith.constant 0 : index
    %0 = vector.load %arg1[%c0, %c0_0] : memref<4x512xf32, #tpu.memory_space<vmem>>, vector<4x512xf32>
    %c0_1 = arith.constant 0 : index
    %c0_2 = arith.constant 0 : index
    %1 = vector.load %arg2[%c0_1, %c0_2] : memref<4x4xf32, #tpu.memory_space<vmem>>, vector<4x4xf32>
    %c0_3 = arith.constant 0 : index
    %c0_4 = arith.constant 0 : index
    %2 = vector.load %arg4[%c0_3, %c0_4] : memref<8x4xf32, #tpu.memory_space<vmem>>, vector<8x4xf32>
    %c0_5 = arith.constant 0 : index
    %c0_6 = arith.constant 0 : index
    %3 = vector.load %arg5[%c0_5, %c0_6] : memref<8x4xf32, #tpu.memory_space<vmem>>, vector<8x4xf32>
    %c0_7 = arith.constant 0 : index
    %c0_8 = arith.constant 0 : index
    %4 = vector.load %arg6[%c0_7, %c0_8] : memref<512x128xf32, #tpu.memory_space<vmem>>, vector<512x128xf32>
    %c0_9 = arith.constant 0 : index
    %5 = memref.load %arg12[%c0_9] : memref<4xf32, #tpu.memory_space<smem>>
    %c1 = arith.constant 1 : index
    %6 = memref.load %arg12[%c1] : memref<4xf32, #tpu.memory_space<smem>>
    %cst = arith.constant dense<0.000000e+00> : vector<4x512xf32>
    %7 = tpu.matmul %1, %0, %cst {dimension_numbers = #tpu.dot_dimension_numbers<[1], [0], [0], [1], [0, 0, 1, 1], [], []>} : vector<4x4xf32>, vector<4x512xf32>, vector<4x512xf32> -> vector<4x512xf32>
    %cst_10 = arith.constant 0.000000e+00 : f32
    %8 = vector.broadcast %cst_10 : f32 to vector<4x512xf32>
    %9 = arith.cmpf oge, %7, %8 : vector<4x512xf32>
    %10 = vector.broadcast %5 : f32 to vector<4x512xf32>
    %11 = arith.mulf %10, %7 : vector<4x512xf32>
    %12 = arith.select %9, %7, %11 : vector<4x512xi1>, vector<4x512xf32>
    %13 = tpu.iota {dimensions = array<i32: 1>} : vector<1x512xi32>
    %c15_i32 = arith.constant 15 : i32
    %14 = vector.broadcast %c15_i32 : i32 to vector<1x512xi32>
    %15 = arith.andi %13, %14 : vector<1x512xi32>
    %c4_i32 = arith.constant 4 : i32
    %16 = vector.broadcast %c4_i32 : i32 to vector<1x512xi32>
    %17 = arith.shrsi %13, %16 : vector<1x512xi32>
    %c15_i32_11 = arith.constant 15 : i32
    %18 = vector.broadcast %c15_i32_11 : i32 to vector<1x512xi32>
    %19 = arith.andi %17, %18 : vector<1x512xi32>
    %c17_i32 = arith.constant 17 : i32
    %20 = tpu.dynamic_rotate %12 by %c17_i32 dim 1 : vector<4x512xf32>, i32 -> vector<4x512xf32>
    %c1_i32 = arith.constant 1 : i32
    %21 = vector.broadcast %c1_i32 : i32 to vector<1x512xi32>
    %22 = arith.cmpi sge, %19, %21 : vector<1x512xi32>
    %c1_i32_12 = arith.constant 1 : i32
    %23 = vector.broadcast %c1_i32_12 : i32 to vector<1x512xi32>
    %24 = arith.cmpi sge, %15, %23 : vector<1x512xi32>
    %25 = arith.andi %22, %24 : vector<1x512xi1>
    %cst_13 = arith.constant 0.000000e+00 : f32
    %26 = vector.shape_cast %25 : vector<1x512xi1> to vector<1x512xi1>
    %27 = vector.broadcast %26 : vector<1x512xi1> to vector<4x512xi1>
    %28 = vector.broadcast %cst_13 : f32 to vector<4x512xf32>
    %29 = arith.select %27, %20, %28 : vector<4x512xi1>, vector<4x512xf32>
    %c0_14 = arith.constant 0 : index
    %c0_15 = arith.constant 0 : index
    %c0_16 = arith.constant 0 : index
    %30 = vector.load %arg3[%c0_14, %c0_15, %c0_16] : memref<9x4x4xf32, #tpu.memory_space<vmem>>, vector<1x4x4xf32>
    %31 = vector.shape_cast %30 : vector<1x4x4xf32> to vector<4x4xf32>
    %cst_17 = arith.constant dense<0.000000e+00> : vector<4x512xf32>
    %32 = tpu.matmul %31, %29, %cst_17 {dimension_numbers = #tpu.dot_dimension_numbers<[1], [0], [0], [1], [0, 0, 1, 1], [], []>} : vector<4x4xf32>, vector<4x512xf32>, vector<4x512xf32> -> vector<4x512xf32>
    %c16_i32 = arith.constant 16 : i32
    %33 = tpu.dynamic_rotate %12 by %c16_i32 dim 1 : vector<4x512xf32>, i32 -> vector<4x512xf32>
    %c1_i32_18 = arith.constant 1 : i32
    %34 = vector.broadcast %c1_i32_18 : i32 to vector<1x512xi32>
    %35 = arith.cmpi sge, %19, %34 : vector<1x512xi32>
    %cst_19 = arith.constant 0.000000e+00 : f32
    %36 = vector.shape_cast %35 : vector<1x512xi1> to vector<1x512xi1>
    %37 = vector.broadcast %36 : vector<1x512xi1> to vector<4x512xi1>
    %38 = vector.broadcast %cst_19 : f32 to vector<4x512xf32>
    %39 = arith.select %37, %33, %38 : vector<4x512xi1>, vector<4x512xf32>
    %c1_20 = arith.constant 1 : index
    %c0_21 = arith.constant 0 : index
    %c0_22 = arith.constant 0 : index
    %40 = vector.load %arg3[%c1_20, %c0_21, %c0_22] : memref<9x4x4xf32, #tpu.memory_space<vmem>>, vector<1x4x4xf32>
    %41 = vector.shape_cast %40 : vector<1x4x4xf32> to vector<4x4xf32>
    %cst_23 = arith.constant dense<0.000000e+00> : vector<4x512xf32>
    %42 = tpu.matmul %41, %39, %cst_23 {dimension_numbers = #tpu.dot_dimension_numbers<[1], [0], [0], [1], [0, 0, 1, 1], [], []>} : vector<4x4xf32>, vector<4x512xf32>, vector<4x512xf32> -> vector<4x512xf32>
    %43 = arith.addf %32, %42 : vector<4x512xf32>
    %c15_i32_24 = arith.constant 15 : i32
    %44 = tpu.dynamic_rotate %12 by %c15_i32_24 dim 1 : vector<4x512xf32>, i32 -> vector<4x512xf32>
    %c1_i32_25 = arith.constant 1 : i32
    %45 = vector.broadcast %c1_i32_25 : i32 to vector<1x512xi32>
    %46 = arith.cmpi sge, %19, %45 : vector<1x512xi32>
    %c15_i32_26 = arith.constant 15 : i32
    %47 = vector.broadcast %c15_i32_26 : i32 to vector<1x512xi32>
    %48 = arith.cmpi slt, %15, %47 : vector<1x512xi32>
    %49 = arith.andi %46, %48 : vector<1x512xi1>
    %cst_27 = arith.constant 0.000000e+00 : f32
    %50 = vector.shape_cast %49 : vector<1x512xi1> to vector<1x512xi1>
    %51 = vector.broadcast %50 : vector<1x512xi1> to vector<4x512xi1>
    %52 = vector.broadcast %cst_27 : f32 to vector<4x512xf32>
    %53 = arith.select %51, %44, %52 : vector<4x512xi1>, vector<4x512xf32>
    %c2 = arith.constant 2 : index
    %c0_28 = arith.constant 0 : index
    %c0_29 = arith.constant 0 : index
    %54 = vector.load %arg3[%c2, %c0_28, %c0_29] : memref<9x4x4xf32, #tpu.memory_space<vmem>>, vector<1x4x4xf32>
    %55 = vector.shape_cast %54 : vector<1x4x4xf32> to vector<4x4xf32>
    %cst_30 = arith.constant dense<0.000000e+00> : vector<4x512xf32>
    %56 = tpu.matmul %55, %53, %cst_30 {dimension_numbers = #tpu.dot_dimension_numbers<[1], [0], [0], [1], [0, 0, 1, 1], [], []>} : vector<4x4xf32>, vector<4x512xf32>, vector<4x512xf32> -> vector<4x512xf32>
    %57 = arith.addf %43, %56 : vector<4x512xf32>
    %c1_i32_31 = arith.constant 1 : i32
    %58 = tpu.dynamic_rotate %12 by %c1_i32_31 dim 1 : vector<4x512xf32>, i32 -> vector<4x512xf32>
    %c1_i32_32 = arith.constant 1 : i32
    %59 = vector.broadcast %c1_i32_32 : i32 to vector<1x512xi32>
    %60 = arith.cmpi sge, %15, %59 : vector<1x512xi32>
    %cst_33 = arith.constant 0.000000e+00 : f32
    %61 = vector.shape_cast %60 : vector<1x512xi1> to vector<1x512xi1>
    %62 = vector.broadcast %61 : vector<1x512xi1> to vector<4x512xi1>
    %63 = vector.broadcast %cst_33 : f32 to vector<4x512xf32>
    %64 = arith.select %62, %58, %63 : vector<4x512xi1>, vector<4x512xf32>
    %c3 = arith.constant 3 : index
    %c0_34 = arith.constant 0 : index
    %c0_35 = arith.constant 0 : index
    %65 = vector.load %arg3[%c3, %c0_34, %c0_35] : memref<9x4x4xf32, #tpu.memory_space<vmem>>, vector<1x4x4xf32>
    %66 = vector.shape_cast %65 : vector<1x4x4xf32> to vector<4x4xf32>
    %cst_36 = arith.constant dense<0.000000e+00> : vector<4x512xf32>
    %67 = tpu.matmul %66, %64, %cst_36 {dimension_numbers = #tpu.dot_dimension_numbers<[1], [0], [0], [1], [0, 0, 1, 1], [], []>} : vector<4x4xf32>, vector<4x512xf32>, vector<4x512xf32> -> vector<4x512xf32>
    %68 = arith.addf %57, %67 : vector<4x512xf32>
    %c4 = arith.constant 4 : index
    %c0_37 = arith.constant 0 : index
    %c0_38 = arith.constant 0 : index
    %69 = vector.load %arg3[%c4, %c0_37, %c0_38] : memref<9x4x4xf32, #tpu.memory_space<vmem>>, vector<1x4x4xf32>
    %70 = vector.shape_cast %69 : vector<1x4x4xf32> to vector<4x4xf32>
    %cst_39 = arith.constant dense<0.000000e+00> : vector<4x512xf32>
    %71 = tpu.matmul %70, %12, %cst_39 {dimension_numbers = #tpu.dot_dimension_numbers<[1], [0], [0], [1], [0, 0, 1, 1], [], []>} : vector<4x4xf32>, vector<4x512xf32>, vector<4x512xf32> -> vector<4x512xf32>
    %72 = arith.addf %68, %71 : vector<4x512xf32>
    %c511_i32 = arith.constant 511 : i32
    %73 = tpu.dynamic_rotate %12 by %c511_i32 dim 1 : vector<4x512xf32>, i32 -> vector<4x512xf32>
    %c15_i32_40 = arith.constant 15 : i32
    %74 = vector.broadcast %c15_i32_40 : i32 to vector<1x512xi32>
    %75 = arith.cmpi slt, %15, %74 : vector<1x512xi32>
    %cst_41 = arith.constant 0.000000e+00 : f32
    %76 = vector.shape_cast %75 : vector<1x512xi1> to vector<1x512xi1>
    %77 = vector.broadcast %76 : vector<1x512xi1> to vector<4x512xi1>
    %78 = vector.broadcast %cst_41 : f32 to vector<4x512xf32>
    %79 = arith.select %77, %73, %78 : vector<4x512xi1>, vector<4x512xf32>
    %c5 = arith.constant 5 : index
    %c0_42 = arith.constant 0 : index
    %c0_43 = arith.constant 0 : index
    %80 = vector.load %arg3[%c5, %c0_42, %c0_43] : memref<9x4x4xf32, #tpu.memory_space<vmem>>, vector<1x4x4xf32>
    %81 = vector.shape_cast %80 : vector<1x4x4xf32> to vector<4x4xf32>
    %cst_44 = arith.constant dense<0.000000e+00> : vector<4x512xf32>
    %82 = tpu.matmul %81, %79, %cst_44 {dimension_numbers = #tpu.dot_dimension_numbers<[1], [0], [0], [1], [0, 0, 1, 1], [], []>} : vector<4x4xf32>, vector<4x512xf32>, vector<4x512xf32> -> vector<4x512xf32>
    %83 = arith.addf %72, %82 : vector<4x512xf32>
    %c497_i32 = arith.constant 497 : i32
    %84 = tpu.dynamic_rotate %12 by %c497_i32 dim 1 : vector<4x512xf32>, i32 -> vector<4x512xf32>
    %c15_i32_45 = arith.constant 15 : i32
    %85 = vector.broadcast %c15_i32_45 : i32 to vector<1x512xi32>
    %86 = arith.cmpi slt, %19, %85 : vector<1x512xi32>
    %c1_i32_46 = arith.constant 1 : i32
    %87 = vector.broadcast %c1_i32_46 : i32 to vector<1x512xi32>
    %88 = arith.cmpi sge, %15, %87 : vector<1x512xi32>
    %89 = arith.andi %86, %88 : vector<1x512xi1>
    %cst_47 = arith.constant 0.000000e+00 : f32
    %90 = vector.shape_cast %89 : vector<1x512xi1> to vector<1x512xi1>
    %91 = vector.broadcast %90 : vector<1x512xi1> to vector<4x512xi1>
    %92 = vector.broadcast %cst_47 : f32 to vector<4x512xf32>
    %93 = arith.select %91, %84, %92 : vector<4x512xi1>, vector<4x512xf32>
    %c6 = arith.constant 6 : index
    %c0_48 = arith.constant 0 : index
    %c0_49 = arith.constant 0 : index
    %94 = vector.load %arg3[%c6, %c0_48, %c0_49] : memref<9x4x4xf32, #tpu.memory_space<vmem>>, vector<1x4x4xf32>
    %95 = vector.shape_cast %94 : vector<1x4x4xf32> to vector<4x4xf32>
    %cst_50 = arith.constant dense<0.000000e+00> : vector<4x512xf32>
    %96 = tpu.matmul %95, %93, %cst_50 {dimension_numbers = #tpu.dot_dimension_numbers<[1], [0], [0], [1], [0, 0, 1, 1], [], []>} : vector<4x4xf32>, vector<4x512xf32>, vector<4x512xf32> -> vector<4x512xf32>
    %97 = arith.addf %83, %96 : vector<4x512xf32>
    %c496_i32 = arith.constant 496 : i32
    %98 = tpu.dynamic_rotate %12 by %c496_i32 dim 1 : vector<4x512xf32>, i32 -> vector<4x512xf32>
    %c15_i32_51 = arith.constant 15 : i32
    %99 = vector.broadcast %c15_i32_51 : i32 to vector<1x512xi32>
    %100 = arith.cmpi slt, %19, %99 : vector<1x512xi32>
    %cst_52 = arith.constant 0.000000e+00 : f32
    %101 = vector.shape_cast %100 : vector<1x512xi1> to vector<1x512xi1>
    %102 = vector.broadcast %101 : vector<1x512xi1> to vector<4x512xi1>
    %103 = vector.broadcast %cst_52 : f32 to vector<4x512xf32>
    %104 = arith.select %102, %98, %103 : vector<4x512xi1>, vector<4x512xf32>
    %c7 = arith.constant 7 : index
    %c0_53 = arith.constant 0 : index
    %c0_54 = arith.constant 0 : index
    %105 = vector.load %arg3[%c7, %c0_53, %c0_54] : memref<9x4x4xf32, #tpu.memory_space<vmem>>, vector<1x4x4xf32>
    %106 = vector.shape_cast %105 : vector<1x4x4xf32> to vector<4x4xf32>
    %cst_55 = arith.constant dense<0.000000e+00> : vector<4x512xf32>
    %107 = tpu.matmul %106, %104, %cst_55 {dimension_numbers = #tpu.dot_dimension_numbers<[1], [0], [0], [1], [0, 0, 1, 1], [], []>} : vector<4x4xf32>, vector<4x512xf32>, vector<4x512xf32> -> vector<4x512xf32>
    %108 = arith.addf %97, %107 : vector<4x512xf32>
    %c495_i32 = arith.constant 495 : i32
    %109 = tpu.dynamic_rotate %12 by %c495_i32 dim 1 : vector<4x512xf32>, i32 -> vector<4x512xf32>
    %c15_i32_56 = arith.constant 15 : i32
    %110 = vector.broadcast %c15_i32_56 : i32 to vector<1x512xi32>
    %111 = arith.cmpi slt, %19, %110 : vector<1x512xi32>
    %c15_i32_57 = arith.constant 15 : i32
    %112 = vector.broadcast %c15_i32_57 : i32 to vector<1x512xi32>
    %113 = arith.cmpi slt, %15, %112 : vector<1x512xi32>
    %114 = arith.andi %111, %113 : vector<1x512xi1>
    %cst_58 = arith.constant 0.000000e+00 : f32
    %115 = vector.shape_cast %114 : vector<1x512xi1> to vector<1x512xi1>
    %116 = vector.broadcast %115 : vector<1x512xi1> to vector<4x512xi1>
    %117 = vector.broadcast %cst_58 : f32 to vector<4x512xf32>
    %118 = arith.select %116, %109, %117 : vector<4x512xi1>, vector<4x512xf32>
    %c8 = arith.constant 8 : index
    %c0_59 = arith.constant 0 : index
    %c0_60 = arith.constant 0 : index
    %119 = vector.load %arg3[%c8, %c0_59, %c0_60] : memref<9x4x4xf32, #tpu.memory_space<vmem>>, vector<1x4x4xf32>
    %120 = vector.shape_cast %119 : vector<1x4x4xf32> to vector<4x4xf32>
    %cst_61 = arith.constant dense<0.000000e+00> : vector<4x512xf32>
    %121 = tpu.matmul %120, %118, %cst_61 {dimension_numbers = #tpu.dot_dimension_numbers<[1], [0], [0], [1], [0, 0, 1, 1], [], []>} : vector<4x4xf32>, vector<4x512xf32>, vector<4x512xf32> -> vector<4x512xf32>
    %122 = arith.addf %108, %121 : vector<4x512xf32>
    %cst_62 = arith.constant 0.000000e+00 : f32
    %123 = vector.broadcast %cst_62 : f32 to vector<4x512xf32>
    %124 = arith.cmpf oge, %122, %123 : vector<4x512xf32>
    %125 = vector.broadcast %6 : f32 to vector<4x512xf32>
    %126 = arith.mulf %125, %122 : vector<4x512xf32>
    %127 = arith.select %124, %122, %126 : vector<4x512xi1>, vector<4x512xf32>
    %cst_63 = arith.constant dense<0.000000e+00> : vector<4x128xf32>
    %128 = tpu.matmul %127, %4, %cst_63 {dimension_numbers = #tpu.dot_dimension_numbers<[1], [0], [0], [1], [0, 0, 1, 1], [], []>} : vector<4x512xf32>, vector<512x128xf32>, vector<4x128xf32> -> vector<4x128xf32>
    %cst_64 = arith.constant dense<0.000000e+00> : vector<4x128xf32>
    %129 = tpu.matmul %0, %4, %cst_64 {dimension_numbers = #tpu.dot_dimension_numbers<[1], [0], [0], [1], [0, 0, 1, 1], [], []>} : vector<4x512xf32>, vector<512x128xf32>, vector<4x128xf32> -> vector<4x128xf32>
    %cst_65 = arith.constant dense<0.000000e+00> : vector<8x128xf32>
    %130 = tpu.matmul %2, %128, %cst_65 {dimension_numbers = #tpu.dot_dimension_numbers<[1], [0], [0], [1], [0, 0, 1, 1], [], []>} : vector<8x4xf32>, vector<4x128xf32>, vector<8x128xf32> -> vector<8x128xf32>
    %cst_66 = arith.constant dense<0.000000e+00> : vector<8x128xf32>
    %131 = tpu.matmul %3, %129, %cst_66 {dimension_numbers = #tpu.dot_dimension_numbers<[1], [0], [0], [1], [0, 0, 1, 1], [], []>} : vector<8x4xf32>, vector<4x128xf32>, vector<8x128xf32> -> vector<8x128xf32>
    %132 = arith.addf %130, %131 : vector<8x128xf32>
    %c0_67 = arith.constant 0 : index
    %c0_68 = arith.constant 0 : index
    %133 = vector.load %arg7[%c0_67, %c0_68] : memref<8x8xf32, #tpu.memory_space<vmem>>, vector<8x8xf32>
    %c0_69 = arith.constant 0 : index
    %c0_70 = arith.constant 0 : index
    %134 = vector.load %arg9[%c0_69, %c0_70] : memref<16x8xf32, #tpu.memory_space<vmem>>, vector<16x8xf32>
    %c0_71 = arith.constant 0 : index
    %c0_72 = arith.constant 0 : index
    %135 = vector.load %arg10[%c0_71, %c0_72] : memref<16x8xf32, #tpu.memory_space<vmem>>, vector<16x8xf32>
    %c0_73 = arith.constant 0 : index
    %c0_74 = arith.constant 0 : index
    %136 = vector.load %arg11[%c0_73, %c0_74] : memref<128x32xf32, #tpu.memory_space<vmem>>, vector<128x32xf32>
    %c2_75 = arith.constant 2 : index
    %137 = memref.load %arg12[%c2_75] : memref<4xf32, #tpu.memory_space<smem>>
    %c3_76 = arith.constant 3 : index
    %138 = memref.load %arg12[%c3_76] : memref<4xf32, #tpu.memory_space<smem>>
    %cst_77 = arith.constant dense<0.000000e+00> : vector<8x128xf32>
    %139 = tpu.matmul %133, %132, %cst_77 {dimension_numbers = #tpu.dot_dimension_numbers<[1], [0], [0], [1], [0, 0, 1, 1], [], []>} : vector<8x8xf32>, vector<8x128xf32>, vector<8x128xf32> -> vector<8x128xf32>
    %cst_78 = arith.constant 0.000000e+00 : f32
    %140 = vector.broadcast %cst_78 : f32 to vector<8x128xf32>
    %141 = arith.cmpf oge, %139, %140 : vector<8x128xf32>
    %142 = vector.broadcast %137 : f32 to vector<8x128xf32>
    %143 = arith.mulf %142, %139 : vector<8x128xf32>
    %144 = arith.select %141, %139, %143 : vector<8x128xi1>, vector<8x128xf32>
    %145 = tpu.iota {dimensions = array<i32: 1>} : vector<1x128xi32>
    %c7_i32 = arith.constant 7 : i32
    %146 = vector.broadcast %c7_i32 : i32 to vector<1x128xi32>
    %147 = arith.andi %145, %146 : vector<1x128xi32>
    %c3_i32 = arith.constant 3 : i32
    %148 = vector.broadcast %c3_i32 : i32 to vector<1x128xi32>
    %149 = arith.shrsi %145, %148 : vector<1x128xi32>
    %c7_i32_79 = arith.constant 7 : i32
    %150 = vector.broadcast %c7_i32_79 : i32 to vector<1x128xi32>
    %151 = arith.andi %149, %150 : vector<1x128xi32>
    %c9_i32 = arith.constant 9 : i32
    %152 = tpu.dynamic_rotate %144 by %c9_i32 dim 1 : vector<8x128xf32>, i32 -> vector<8x128xf32>
    %c1_i32_80 = arith.constant 1 : i32
    %153 = vector.broadcast %c1_i32_80 : i32 to vector<1x128xi32>
    %154 = arith.cmpi sge, %151, %153 : vector<1x128xi32>
    %c1_i32_81 = arith.constant 1 : i32
    %155 = vector.broadcast %c1_i32_81 : i32 to vector<1x128xi32>
    %156 = arith.cmpi sge, %147, %155 : vector<1x128xi32>
    %157 = arith.andi %154, %156 : vector<1x128xi1>
    %cst_82 = arith.constant 0.000000e+00 : f32
    %158 = vector.shape_cast %157 : vector<1x128xi1> to vector<1x128xi1>
    %159 = vector.broadcast %158 : vector<1x128xi1> to vector<8x128xi1>
    %160 = vector.broadcast %cst_82 : f32 to vector<8x128xf32>
    %161 = arith.select %159, %152, %160 : vector<8x128xi1>, vector<8x128xf32>
    %c0_83 = arith.constant 0 : index
    %c0_84 = arith.constant 0 : index
    %c0_85 = arith.constant 0 : index
    %162 = vector.load %arg8[%c0_83, %c0_84, %c0_85] : memref<9x8x8xf32, #tpu.memory_space<vmem>>, vector<1x8x8xf32>
    %163 = vector.shape_cast %162 : vector<1x8x8xf32> to vector<8x8xf32>
    %cst_86 = arith.constant dense<0.000000e+00> : vector<8x128xf32>
    %164 = tpu.matmul %163, %161, %cst_86 {dimension_numbers = #tpu.dot_dimension_numbers<[1], [0], [0], [1], [0, 0, 1, 1], [], []>} : vector<8x8xf32>, vector<8x128xf32>, vector<8x128xf32> -> vector<8x128xf32>
    %c8_i32 = arith.constant 8 : i32
    %165 = tpu.dynamic_rotate %144 by %c8_i32 dim 1 : vector<8x128xf32>, i32 -> vector<8x128xf32>
    %c1_i32_87 = arith.constant 1 : i32
    %166 = vector.broadcast %c1_i32_87 : i32 to vector<1x128xi32>
    %167 = arith.cmpi sge, %151, %166 : vector<1x128xi32>
    %cst_88 = arith.constant 0.000000e+00 : f32
    %168 = vector.shape_cast %167 : vector<1x128xi1> to vector<1x128xi1>
    %169 = vector.broadcast %168 : vector<1x128xi1> to vector<8x128xi1>
    %170 = vector.broadcast %cst_88 : f32 to vector<8x128xf32>
    %171 = arith.select %169, %165, %170 : vector<8x128xi1>, vector<8x128xf32>
    %c1_89 = arith.constant 1 : index
    %c0_90 = arith.constant 0 : index
    %c0_91 = arith.constant 0 : index
    %172 = vector.load %arg8[%c1_89, %c0_90, %c0_91] : memref<9x8x8xf32, #tpu.memory_space<vmem>>, vector<1x8x8xf32>
    %173 = vector.shape_cast %172 : vector<1x8x8xf32> to vector<8x8xf32>
    %cst_92 = arith.constant dense<0.000000e+00> : vector<8x128xf32>
    %174 = tpu.matmul %173, %171, %cst_92 {dimension_numbers = #tpu.dot_dimension_numbers<[1], [0], [0], [1], [0, 0, 1, 1], [], []>} : vector<8x8xf32>, vector<8x128xf32>, vector<8x128xf32> -> vector<8x128xf32>
    %175 = arith.addf %164, %174 : vector<8x128xf32>
    %c7_i32_93 = arith.constant 7 : i32
    %176 = tpu.dynamic_rotate %144 by %c7_i32_93 dim 1 : vector<8x128xf32>, i32 -> vector<8x128xf32>
    %c1_i32_94 = arith.constant 1 : i32
    %177 = vector.broadcast %c1_i32_94 : i32 to vector<1x128xi32>
    %178 = arith.cmpi sge, %151, %177 : vector<1x128xi32>
    %c7_i32_95 = arith.constant 7 : i32
    %179 = vector.broadcast %c7_i32_95 : i32 to vector<1x128xi32>
    %180 = arith.cmpi slt, %147, %179 : vector<1x128xi32>
    %181 = arith.andi %178, %180 : vector<1x128xi1>
    %cst_96 = arith.constant 0.000000e+00 : f32
    %182 = vector.shape_cast %181 : vector<1x128xi1> to vector<1x128xi1>
    %183 = vector.broadcast %182 : vector<1x128xi1> to vector<8x128xi1>
    %184 = vector.broadcast %cst_96 : f32 to vector<8x128xf32>
    %185 = arith.select %183, %176, %184 : vector<8x128xi1>, vector<8x128xf32>
    %c2_97 = arith.constant 2 : index
    %c0_98 = arith.constant 0 : index
    %c0_99 = arith.constant 0 : index
    %186 = vector.load %arg8[%c2_97, %c0_98, %c0_99] : memref<9x8x8xf32, #tpu.memory_space<vmem>>, vector<1x8x8xf32>
    %187 = vector.shape_cast %186 : vector<1x8x8xf32> to vector<8x8xf32>
    %cst_100 = arith.constant dense<0.000000e+00> : vector<8x128xf32>
    %188 = tpu.matmul %187, %185, %cst_100 {dimension_numbers = #tpu.dot_dimension_numbers<[1], [0], [0], [1], [0, 0, 1, 1], [], []>} : vector<8x8xf32>, vector<8x128xf32>, vector<8x128xf32> -> vector<8x128xf32>
    %189 = arith.addf %175, %188 : vector<8x128xf32>
    %c1_i32_101 = arith.constant 1 : i32
    %190 = tpu.dynamic_rotate %144 by %c1_i32_101 dim 1 : vector<8x128xf32>, i32 -> vector<8x128xf32>
    %c1_i32_102 = arith.constant 1 : i32
    %191 = vector.broadcast %c1_i32_102 : i32 to vector<1x128xi32>
    %192 = arith.cmpi sge, %147, %191 : vector<1x128xi32>
    %cst_103 = arith.constant 0.000000e+00 : f32
    %193 = vector.shape_cast %192 : vector<1x128xi1> to vector<1x128xi1>
    %194 = vector.broadcast %193 : vector<1x128xi1> to vector<8x128xi1>
    %195 = vector.broadcast %cst_103 : f32 to vector<8x128xf32>
    %196 = arith.select %194, %190, %195 : vector<8x128xi1>, vector<8x128xf32>
    %c3_104 = arith.constant 3 : index
    %c0_105 = arith.constant 0 : index
    %c0_106 = arith.constant 0 : index
    %197 = vector.load %arg8[%c3_104, %c0_105, %c0_106] : memref<9x8x8xf32, #tpu.memory_space<vmem>>, vector<1x8x8xf32>
    %198 = vector.shape_cast %197 : vector<1x8x8xf32> to vector<8x8xf32>
    %cst_107 = arith.constant dense<0.000000e+00> : vector<8x128xf32>
    %199 = tpu.matmul %198, %196, %cst_107 {dimension_numbers = #tpu.dot_dimension_numbers<[1], [0], [0], [1], [0, 0, 1, 1], [], []>} : vector<8x8xf32>, vector<8x128xf32>, vector<8x128xf32> -> vector<8x128xf32>
    %200 = arith.addf %189, %199 : vector<8x128xf32>
    %c4_108 = arith.constant 4 : index
    %c0_109 = arith.constant 0 : index
    %c0_110 = arith.constant 0 : index
    %201 = vector.load %arg8[%c4_108, %c0_109, %c0_110] : memref<9x8x8xf32, #tpu.memory_space<vmem>>, vector<1x8x8xf32>
    %202 = vector.shape_cast %201 : vector<1x8x8xf32> to vector<8x8xf32>
    %cst_111 = arith.constant dense<0.000000e+00> : vector<8x128xf32>
    %203 = tpu.matmul %202, %144, %cst_111 {dimension_numbers = #tpu.dot_dimension_numbers<[1], [0], [0], [1], [0, 0, 1, 1], [], []>} : vector<8x8xf32>, vector<8x128xf32>, vector<8x128xf32> -> vector<8x128xf32>
    %204 = arith.addf %200, %203 : vector<8x128xf32>
    %c127_i32 = arith.constant 127 : i32
    %205 = tpu.dynamic_rotate %144 by %c127_i32 dim 1 : vector<8x128xf32>, i32 -> vector<8x128xf32>
    %c7_i32_112 = arith.constant 7 : i32
    %206 = vector.broadcast %c7_i32_112 : i32 to vector<1x128xi32>
    %207 = arith.cmpi slt, %147, %206 : vector<1x128xi32>
    %cst_113 = arith.constant 0.000000e+00 : f32
    %208 = vector.shape_cast %207 : vector<1x128xi1> to vector<1x128xi1>
    %209 = vector.broadcast %208 : vector<1x128xi1> to vector<8x128xi1>
    %210 = vector.broadcast %cst_113 : f32 to vector<8x128xf32>
    %211 = arith.select %209, %205, %210 : vector<8x128xi1>, vector<8x128xf32>
    %c5_114 = arith.constant 5 : index
    %c0_115 = arith.constant 0 : index
    %c0_116 = arith.constant 0 : index
    %212 = vector.load %arg8[%c5_114, %c0_115, %c0_116] : memref<9x8x8xf32, #tpu.memory_space<vmem>>, vector<1x8x8xf32>
    %213 = vector.shape_cast %212 : vector<1x8x8xf32> to vector<8x8xf32>
    %cst_117 = arith.constant dense<0.000000e+00> : vector<8x128xf32>
    %214 = tpu.matmul %213, %211, %cst_117 {dimension_numbers = #tpu.dot_dimension_numbers<[1], [0], [0], [1], [0, 0, 1, 1], [], []>} : vector<8x8xf32>, vector<8x128xf32>, vector<8x128xf32> -> vector<8x128xf32>
    %215 = arith.addf %204, %214 : vector<8x128xf32>
    %c121_i32 = arith.constant 121 : i32
    %216 = tpu.dynamic_rotate %144 by %c121_i32 dim 1 : vector<8x128xf32>, i32 -> vector<8x128xf32>
    %c7_i32_118 = arith.constant 7 : i32
    %217 = vector.broadcast %c7_i32_118 : i32 to vector<1x128xi32>
    %218 = arith.cmpi slt, %151, %217 : vector<1x128xi32>
    %c1_i32_119 = arith.constant 1 : i32
    %219 = vector.broadcast %c1_i32_119 : i32 to vector<1x128xi32>
    %220 = arith.cmpi sge, %147, %219 : vector<1x128xi32>
    %221 = arith.andi %218, %220 : vector<1x128xi1>
    %cst_120 = arith.constant 0.000000e+00 : f32
    %222 = vector.shape_cast %221 : vector<1x128xi1> to vector<1x128xi1>
    %223 = vector.broadcast %222 : vector<1x128xi1> to vector<8x128xi1>
    %224 = vector.broadcast %cst_120 : f32 to vector<8x128xf32>
    %225 = arith.select %223, %216, %224 : vector<8x128xi1>, vector<8x128xf32>
    %c6_121 = arith.constant 6 : index
    %c0_122 = arith.constant 0 : index
    %c0_123 = arith.constant 0 : index
    %226 = vector.load %arg8[%c6_121, %c0_122, %c0_123] : memref<9x8x8xf32, #tpu.memory_space<vmem>>, vector<1x8x8xf32>
    %227 = vector.shape_cast %226 : vector<1x8x8xf32> to vector<8x8xf32>
    %cst_124 = arith.constant dense<0.000000e+00> : vector<8x128xf32>
    %228 = tpu.matmul %227, %225, %cst_124 {dimension_numbers = #tpu.dot_dimension_numbers<[1], [0], [0], [1], [0, 0, 1, 1], [], []>} : vector<8x8xf32>, vector<8x128xf32>, vector<8x128xf32> -> vector<8x128xf32>
    %229 = arith.addf %215, %228 : vector<8x128xf32>
    %c120_i32 = arith.constant 120 : i32
    %230 = tpu.dynamic_rotate %144 by %c120_i32 dim 1 : vector<8x128xf32>, i32 -> vector<8x128xf32>
    %c7_i32_125 = arith.constant 7 : i32
    %231 = vector.broadcast %c7_i32_125 : i32 to vector<1x128xi32>
    %232 = arith.cmpi slt, %151, %231 : vector<1x128xi32>
    %cst_126 = arith.constant 0.000000e+00 : f32
    %233 = vector.shape_cast %232 : vector<1x128xi1> to vector<1x128xi1>
    %234 = vector.broadcast %233 : vector<1x128xi1> to vector<8x128xi1>
    %235 = vector.broadcast %cst_126 : f32 to vector<8x128xf32>
    %236 = arith.select %234, %230, %235 : vector<8x128xi1>, vector<8x128xf32>
    %c7_127 = arith.constant 7 : index
    %c0_128 = arith.constant 0 : index
    %c0_129 = arith.constant 0 : index
    %237 = vector.load %arg8[%c7_127, %c0_128, %c0_129] : memref<9x8x8xf32, #tpu.memory_space<vmem>>, vector<1x8x8xf32>
    %238 = vector.shape_cast %237 : vector<1x8x8xf32> to vector<8x8xf32>
    %cst_130 = arith.constant dense<0.000000e+00> : vector<8x128xf32>
    %239 = tpu.matmul %238, %236, %cst_130 {dimension_numbers = #tpu.dot_dimension_numbers<[1], [0], [0], [1], [0, 0, 1, 1], [], []>} : vector<8x8xf32>, vector<8x128xf32>, vector<8x128xf32> -> vector<8x128xf32>
    %240 = arith.addf %229, %239 : vector<8x128xf32>
    %c119_i32 = arith.constant 119 : i32
    %241 = tpu.dynamic_rotate %144 by %c119_i32 dim 1 : vector<8x128xf32>, i32 -> vector<8x128xf32>
    %c7_i32_131 = arith.constant 7 : i32
    %242 = vector.broadcast %c7_i32_131 : i32 to vector<1x128xi32>
    %243 = arith.cmpi slt, %151, %242 : vector<1x128xi32>
    %c7_i32_132 = arith.constant 7 : i32
    %244 = vector.broadcast %c7_i32_132 : i32 to vector<1x128xi32>
    %245 = arith.cmpi slt, %147, %244 : vector<1x128xi32>
    %246 = arith.andi %243, %245 : vector<1x128xi1>
    %cst_133 = arith.constant 0.000000e+00 : f32
    %247 = vector.shape_cast %246 : vector<1x128xi1> to vector<1x128xi1>
    %248 = vector.broadcast %247 : vector<1x128xi1> to vector<8x128xi1>
    %249 = vector.broadcast %cst_133 : f32 to vector<8x128xf32>
    %250 = arith.select %248, %241, %249 : vector<8x128xi1>, vector<8x128xf32>
    %c8_134 = arith.constant 8 : index
    %c0_135 = arith.constant 0 : index
    %c0_136 = arith.constant 0 : index
    %251 = vector.load %arg8[%c8_134, %c0_135, %c0_136] : memref<9x8x8xf32, #tpu.memory_space<vmem>>, vector<1x8x8xf32>
    %252 = vector.shape_cast %251 : vector<1x8x8xf32> to vector<8x8xf32>
    %cst_137 = arith.constant dense<0.000000e+00> : vector<8x128xf32>
    %253 = tpu.matmul %252, %250, %cst_137 {dimension_numbers = #tpu.dot_dimension_numbers<[1], [0], [0], [1], [0, 0, 1, 1], [], []>} : vector<8x8xf32>, vector<8x128xf32>, vector<8x128xf32> -> vector<8x128xf32>
    %254 = arith.addf %240, %253 : vector<8x128xf32>
    %cst_138 = arith.constant 0.000000e+00 : f32
    %255 = vector.broadcast %cst_138 : f32 to vector<8x128xf32>
    %256 = arith.cmpf oge, %254, %255 : vector<8x128xf32>
    %257 = vector.broadcast %138 : f32 to vector<8x128xf32>
    %258 = arith.mulf %257, %254 : vector<8x128xf32>
    %259 = arith.select %256, %254, %258 : vector<8x128xi1>, vector<8x128xf32>
    %cst_139 = arith.constant dense<0.000000e+00> : vector<8x32xf32>
    %260 = tpu.matmul %259, %136, %cst_139 {dimension_numbers = #tpu.dot_dimension_numbers<[1], [0], [0], [1], [0, 0, 1, 1], [], []>} : vector<8x128xf32>, vector<128x32xf32>, vector<8x32xf32> -> vector<8x32xf32>
    %cst_140 = arith.constant dense<0.000000e+00> : vector<8x32xf32>
    %261 = tpu.matmul %132, %136, %cst_140 {dimension_numbers = #tpu.dot_dimension_numbers<[1], [0], [0], [1], [0, 0, 1, 1], [], []>} : vector<8x128xf32>, vector<128x32xf32>, vector<8x32xf32> -> vector<8x32xf32>
    %cst_141 = arith.constant dense<0.000000e+00> : vector<16x32xf32>
    %262 = tpu.matmul %134, %260, %cst_141 {dimension_numbers = #tpu.dot_dimension_numbers<[1], [0], [0], [1], [0, 0, 1, 1], [], []>} : vector<16x8xf32>, vector<8x32xf32>, vector<16x32xf32> -> vector<16x32xf32>
    %cst_142 = arith.constant dense<0.000000e+00> : vector<16x32xf32>
    %263 = tpu.matmul %135, %261, %cst_142 {dimension_numbers = #tpu.dot_dimension_numbers<[1], [0], [0], [1], [0, 0, 1, 1], [], []>} : vector<16x8xf32>, vector<8x32xf32>, vector<16x32xf32> -> vector<16x32xf32>
    %264 = arith.addf %262, %263 : vector<16x32xf32>
    %c0_143 = arith.constant 0 : index
    %c0_144 = arith.constant 0 : index
    %265 = vector.load %arg13[%c0_143, %c0_144] : memref<16x32xf32, #tpu.memory_space<vmem>>, vector<16x32xf32>
    tpu.vector_store %arg13[%c0_143, %c0_144], %264 {strides = array<i32>} : memref<16x32xf32, #tpu.memory_space<vmem>>, vector<16x32xf32>,
    return
  }
  func.func @transform_0(%arg0: i32) -> (i32, i32) {
    %c0_i32 = arith.constant 0 : i32
    %c0_i32_0 = arith.constant 0 : i32
    return %c0_i32, %arg0 : i32, i32
  }
  func.func @transform_1(%arg0: i32) -> (i32, i32) {
    %c0_i32 = arith.constant 0 : i32
    %c0_i32_0 = arith.constant 0 : i32
    %c0_i32_1 = arith.constant 0 : i32
    return %c0_i32, %c0_i32_0 : i32, i32
  }
  func.func @transform_2(%arg0: i32) -> (i32, i32, i32) {
    %c0_i32 = arith.constant 0 : i32
    %c0_i32_0 = arith.constant 0 : i32
    %c0_i32_1 = arith.constant 0 : i32
    %c0_i32_2 = arith.constant 0 : i32
    return %c0_i32, %c0_i32_0, %c0_i32_1 : i32, i32, i32
  }
  func.func @transform_3(%arg0: i32) -> (i32, i32) {
    %c0_i32 = arith.constant 0 : i32
    %c0_i32_0 = arith.constant 0 : i32
    %c0_i32_1 = arith.constant 0 : i32
    return %c0_i32, %c0_i32_0 : i32, i32
  }
  func.func @transform_4(%arg0: i32) -> (i32, i32) {
    %c0_i32 = arith.constant 0 : i32
    %c0_i32_0 = arith.constant 0 : i32
    %c0_i32_1 = arith.constant 0 : i32
    return %c0_i32, %c0_i32_0 : i32, i32
  }
  func.func @transform_5(%arg0: i32) -> (i32, i32) {
    %c0_i32 = arith.constant 0 : i32
    %c0_i32_0 = arith.constant 0 : i32
    %c0_i32_1 = arith.constant 0 : i32
    return %c0_i32, %c0_i32_0 : i32, i32
  }
  func.func @transform_6(%arg0: i32) -> (i32, i32) {
    %c0_i32 = arith.constant 0 : i32
    %c0_i32_0 = arith.constant 0 : i32
    %c0_i32_1 = arith.constant 0 : i32
    return %c0_i32, %c0_i32_0 : i32, i32
  }
  func.func @transform_7(%arg0: i32) -> (i32, i32, i32) {
    %c0_i32 = arith.constant 0 : i32
    %c0_i32_0 = arith.constant 0 : i32
    %c0_i32_1 = arith.constant 0 : i32
    %c0_i32_2 = arith.constant 0 : i32
    return %c0_i32, %c0_i32_0, %c0_i32_1 : i32, i32, i32
  }
  func.func @transform_8(%arg0: i32) -> (i32, i32) {
    %c0_i32 = arith.constant 0 : i32
    %c0_i32_0 = arith.constant 0 : i32
    %c0_i32_1 = arith.constant 0 : i32
    return %c0_i32, %c0_i32_0 : i32, i32
  }
  func.func @transform_9(%arg0: i32) -> (i32, i32) {
    %c0_i32 = arith.constant 0 : i32
    %c0_i32_0 = arith.constant 0 : i32
    %c0_i32_1 = arith.constant 0 : i32
    return %c0_i32, %c0_i32_0 : i32, i32
  }
  func.func @transform_10(%arg0: i32) -> (i32, i32) {
    %c0_i32 = arith.constant 0 : i32
    %c0_i32_0 = arith.constant 0 : i32
    %c0_i32_1 = arith.constant 0 : i32
    return %c0_i32, %c0_i32_0 : i32, i32
  }
  func.func @transform_11(%arg0: i32) -> i32 {
    %c0_i32 = arith.constant 0 : i32
    %c0_i32_0 = arith.constant 0 : i32
    return %c0_i32 : i32
  }
  func.func @transform_12(%arg0: i32) -> (i32, i32) {
    %c0_i32 = arith.constant 0 : i32
    %c0_i32_0 = arith.constant 0 : i32
    return %c0_i32, %arg0 : i32, i32
  }
}

</mosaic_0001>

<bundles_post_ra>
// kernel: downsample_forward.1
= control target key start
LH: loop header
LB: loop body
LE: loop exit
PB: predicated region body
PF: predicated region fallthrough
CT: control target
= control target key end

     0   :  { %17 = vsyncpa [#allocation3], 0  ;;  %s5412_s0 = inlined_call_operand.vmem [shape: f32[4,512], index: 0, kind: input, shape index: {}]   ;;  %s5413_s1 = inlined_call_operand.vmem [shape: f32[4,4], index: 1, kind: input, shape index: {}]   ;;  %s5414_s2 = inlined_call_operand.vmem [shape: f32[9,4,4], index: 2, kind: input, shape index: {}]   ;;  %s5415_s3 = inlined_call_operand.vmem [shape: f32[8,4], index: 3, kind: input, shape index: {}]   ;;  %s5416_s4 = inlined_call_operand.vmem [shape: f32[8,4], index: 4, kind: input, shape index: {}]   ;;  %s5417_s5 = inlined_call_operand.vmem [shape: f32[512,128], index: 5, kind: input, shape index: {}]   ;;  %s5418_s6 = inlined_call_operand.vmem [shape: f32[8,8], index: 6, kind: input, shape index: {}]   ;;  %s5419_s7 = inlined_call_operand.vmem [shape: f32[9,8,8], index: 7, kind: input, shape index: {}]   ;;  %s5420_s8 = inlined_call_operand.vmem [shape: f32[16,8], index: 8, kind: input, shape index: {}]   ;;  %s5421_s9 = inlined_call_operand.vmem [shape: f32[16,8], index: 9, kind: input, shape index: {}]   ;;  %s5422_s10 = inlined_call_operand.vmem [shape: f32[128,32], index: 10, kind: input, shape index: {}]   ;;  %s5423_s11 = inlined_call_operand.vmem [shape: f32[4], index: 11, kind: input, shape index: {}]   ;;  %s5424_s12 = inlined_call_operand.vmem [shape: f32[16,32], index: 12, kind: output, shape index: {}]  }
   0x1   :  { %s46_s23 = sshll.u32 %s5423_s11, 4  ;;  %s47_s23 = int_to_ptr.vmem [resolvable:$true] %s46_s23 }
   0x2   :  { %s4295_s24 = scalar_lea.vmem %s47_s23, 16  ;;  %p4300_p1 = scmp.lt.s32.totalorder %s47_s23, %s47_s23 }
   0x3   :  { %p4296_p0 = scmp.ne.s32.totalorder %s47_s23, %s4295_s24  ;;  %p4301_p2 = scmp.lt.s32.totalorder %s4295_s24, %s4295_s24 }
   0x5   :  { %p4302_p3 = por %p4301_p2, %p4300_p1 }
   0x7   :  { %p4303_p4 = pnand %p4302_p3, %p4296_p0 }
   0x9   :  { %4306 = shalt.err (!%p4303_p4)
}
   0xa   :  { %s4309_s25 = smov [#allocation2]  }
   0xb   :  { %49 = dma.vmem_to_smem %s47_s23, 16, %s4309_s25, [#allocation3]  }
   0xc   :  { %4307 = dma.done.wait [#allocation3], 16  }
   0xd   :  { %4308 = vsyncadd [#allocation3], 4294967280 }
   0xe   :  { %53 = sfence }
   0xf   :  { %v4398_v0 = vld [vmem:[%s5412_s0] sm:$0xff]  ;;  %vm133_vm0 = vcmask 1043456   ;;  %v4310_v2 = vmov 0.0   ;;  %v4408_v3 = vld [vmem:[%s5412_s0 + $0x8] sm:$0xff]  ;;  %vm129_vm1 = vcmask 31744   ;;  %s123_s0 = sld [smem:[#allocation2]]  ;;  %v297_v19 = vlaneseq }
  0x10   :  { %v4402_v1 = vcombine.high %v4398_v0, %v4398_v0  ;;  %206 = vmatprep.mubr.f32.mxu1 %v4310_v2  ;;  %807 = vmatprep.mubr.f32.mxu0 %v4310_v2  ;;  %v56_v4 = vld [vmem:[%s5413_s1] sm:$0xf]  ;;  %v4416_v5 = vcombine.high %v4408_v3, %v4408_v3  ;;  %s4311_s1 = smov 16   ;;  %s4312_s13 = smov 17   ;;  %v3605_v39 = vld [vmem:[%s5414_s2 + $0x4] sm:$0xf] }
  0x11   :  { %s4313_s14 = smov 15   ;;  %s4314_s15 = smov 1   ;;  %v4478_v20 = vand.u32 127, %v297_v19  ;;  %v351_v62 = vld [vmem:[%s5414_s2] sm:$0xf]  ;;  %v93_v45 = vld [vmem:[%s5417_s5 + $0x110] sm:$0xff] }
  0x12   :  { %3599 = vmatprep.subr.msk.mxu1 %vm133_vm0, %v4402_v1  ;;  %s4315_s16 = smov 127   ;;  %s4316_s17 = smov 113  }
  0x13   :  { %3600 = vmatpush1.msk.msra.mxu1 %vm133_vm0, %v4398_v0  ;;  %s4317_s18 = smov 112   ;;  %s4318_s19 = smov 111   ;;  %v299_v21 = vadd.s32 128, %v4478_v20  ;;  %v306_v23 = vshra.s32 %v4478_v20, 4  ;;  %v4483_v24 = vadd.s32 256, %v4478_v20  ;;  %v4486_v25 = vadd.s32 384, %v4478_v20 }
  0x14   :  { %3601 = vmatmul.mubr.msk.f32.vlgmr.msra.gmra.mrb[0].mxu1 %vm129_vm1, %v56_v4  ;;  %3602 = vmatprep.subr.msk.mxu1 %vm133_vm0, %v4416_v5  ;;  %vm360_vm6 = vcmp.lt.s32.totalorder %v4478_v20, 16  ;;  %v302_v40 = vand.u32 15, %v4478_v20  ;;  %vm322_vm12 = vcmp.lt.s32.totalorder %v4478_v20, 17  ;;  %s3598_s26 = sld [smem:[#allocation2 + $0x1]]  ;;  %s4321_s30 = smov 8  }
  0x15   :  { %3603 = vmatpush1.msk.msra.mxu1 %vm133_vm0, %v4408_v3  ;;  %277 = vmatprep.mubr.f32.mxu1 %v4310_v2  ;;  %v288_v6 = vstv %s123_s0  ;;  %v307_v22 = vshra.s32 %v299_v21, 4  ;;  %v4490_v28 = vand.u32 15, %v306_v23  ;;  %v308_v29 = vshra.s32 %v4483_v24, 4  ;;  %s4322_s0 = smov 7  }
  0x16   :  { %v309_v30 = vshra.s32 %v4486_v25, 4  ;;  %v303_v36 = vand.u32 15, %v299_v21  ;;  %v304_v43 = vand.u32 15, %v4483_v24  ;;  %v305_v46 = vand.u32 15, %v4486_v25 }
  0x17   :  { %v4488_v26 = vand.u32 15, %v307_v22  ;;  %vm327_vm8 = vcmp.ge.s32.totalorder %v4490_v28, 1  ;;  %v4497_v32 = vand.u32 15, %v308_v29  ;;  %vm4529_vm13 = vcmp.ge.s32.totalorder %v302_v40, 1 }
  0x18   :  { %3604 = vmatmul.mubr.msk.f32.vlgmr.msra.gmra.mrb[2].mxu1 %vm129_vm1, %v56_v4  ;;  %v4499_v33 = vand.u32 15, %v309_v30  ;;  %vm4519_vm11 = vcmp.ge.s32.totalorder %v303_v36, 1  ;;  %vm4547_vm15 = vcmp.ge.s32.totalorder %v304_v43, 1 }
  0x19   :  { %458 = vmatprep.mubr.f32.mxu1 %v4310_v2  ;;  %vm328_vm7 = vcmp.ge.s32.totalorder %v4488_v26, 1  ;;  %vm329_vm9 = vcmp.ge.s32.totalorder %v4497_v32, 1 }
  0x1a   :  { %vm5425_vm10 = vcmp.ge.s32.totalorder %v4499_v33, 1  ;;  %vm4543_vm14 = vmand %vm328_vm7, %vm4519_vm11 }
  0xe7   :  { %v208_v7 = vpop.f32.mrb[0].mxu1 }
  0xe8   :  { %vm284_vm2 = vcmp.ge.f32.partialorder %v208_v7, 0.0  ;;  %v289_v8 = vmul.f32 %v288_v6, %v208_v7  ;;  %v210_v9 = vpop.f32.mrb[1].mxu1 }
  0xe9   :  { %v290_v11 = vmul.f32 %v288_v6, %v210_v9  ;;  %vm285_vm3 = vcmp.ge.f32.partialorder %v210_v9, 0.0 }
  0xea   :  { %v4430_v10 = vsel %vm284_vm2, %v208_v7, %v289_v8  ;;  %vm4555_vm2 = vmand %vm327_vm8, %vm4529_vm13 }
  0xeb   :  { %352 = vrot.lane.b32.xlu0 %v4430_v10, %s4311_s1  ;;  %v279_v12 = vpop.f32.mrb[2].mxu1  ;;  %v4433_v15 = vsel %vm285_vm3, %v210_v9, %v290_v11  ;;  %vm4562_vm3 = vcmp.ge.s32.totalorder %v305_v46, 1 }
  0xec   :  { %v281_v13 = vpop.f32.mrb[3].mxu1  ;;  %v291_v16 = vmul.f32 %v288_v6, %v279_v12  ;;  %vm286_vm5 = vcmp.ge.f32.partialorder %v279_v12, 0.0 }
  0xed   :  { %vm287_vm4 = vcmp.ge.f32.partialorder %v281_v13, 0.0  ;;  %v292_v14 = vmul.f32 %v288_v6, %v281_v13 }
  0xee   :  { %v4439_v18 = vsel %vm286_vm5, %v279_v12, %v291_v16  ;;  %vm338_vm5 = vmand %vm5425_vm10, %vm4562_vm3  ;;  %v75_v16 = vld [vmem:[%s5417_s5 + $0x80] sm:$0xff] }
  0xef   :  { %v4435_v17 = vsel %vm287_vm4, %v281_v13, %v292_v14  ;;  %354 = vrot.lane.b32.xlu0 %v4433_v15, %s4311_s1  ;;  %vm4576_vm4 = vmand %vm329_vm9, %vm4547_vm15 }
  0xf0   :  { %358 = vrot.lane.b32.xlu1 %v4435_v17, %s4311_s1 }
  0xf3   :  { %314 = vrot.lane.b32.xlu0 %v4430_v10, %s4312_s13 }
  0xf4   :  { %356 = vrot.lane.b32.xlu1 %v4439_v18, %s4311_s1  ;;  %s4323_s1 = smov 121  }
  0xf7   :  { %320 = vrot.lane.b32.xlu0 %v4435_v17, %s4312_s13 }
  0xf8   :  { %316 = vrot.lane.b32.xlu1 %v4433_v15, %s4312_s13 }
  0xfb   :  { %693 = vrot.lane.b32.xlu0 %v4430_v10, %s4313_s14 }
  0xfc   :  { %318 = vrot.lane.b32.xlu1 %v4439_v18, %s4312_s13  ;;  %s4324_s13 = smov 119  }
  0xff   :  { %699 = vrot.lane.b32.xlu0 %v4435_v17, %s4313_s14 }
 0x100   :  { %695 = vrot.lane.b32.xlu1 %v4433_v15, %s4313_s14 }
 0x103   :  { %889 = vrot.lane.b32.xlu0 %v4430_v10, %s4314_s15 }
 0x104   :  { %697 = vrot.lane.b32.xlu1 %v4439_v18, %s4313_s14  ;;  %s4325_s14 = smov 120  }
 0x107   :  { %895 = vrot.lane.b32.xlu0 %v4435_v17, %s4314_s15 }
 0x108   :  { %891 = vrot.lane.b32.xlu1 %v4433_v15, %s4314_s15 }
 0x10b   :  { %1242 = vrot.lane.b32.xlu0 %v4433_v15, %s4315_s16 }
 0x10c   :  { %893 = vrot.lane.b32.xlu1 %v4439_v18, %s4314_s15 }
 0x10f   :  { %1240 = vrot.lane.b32.xlu0 %v4430_v10, %s4315_s16 }
 0x110   :  { %1244 = vrot.lane.b32.xlu1 %v4439_v18, %s4315_s16 }
 0x113   :  { %1430 = vrot.lane.b32.xlu0 %v4433_v15, %s4316_s17 }
 0x114   :  { %1246 = vrot.lane.b32.xlu1 %v4435_v17, %s4315_s16 }
 0x117   :  { %1428 = vrot.lane.b32.xlu0 %v4430_v10, %s4316_s17 }
 0x118   :  { %1432 = vrot.lane.b32.xlu1 %v4439_v18, %s4316_s17 }
 0x11b   :  { %1626 = vrot.lane.b32.xlu0 %v4433_v15, %s4317_s18 }
 0x11c   :  { %1434 = vrot.lane.b32.xlu1 %v4435_v17, %s4316_s17 }
 0x11f   :  { %1624 = vrot.lane.b32.xlu0 %v4430_v10, %s4317_s18 }
 0x120   :  { %1628 = vrot.lane.b32.xlu1 %v4439_v18, %s4317_s18 }
 0x123   :  { %1814 = vrot.lane.b32.xlu0 %v4433_v15, %s4318_s19 }
 0x124   :  { %1630 = vrot.lane.b32.xlu1 %v4435_v17, %s4317_s18 }
 0x127   :  { %1812 = vrot.lane.b32.xlu0 %v4430_v10, %s4318_s19 }
 0x128   :  { %1816 = vrot.lane.b32.xlu1 %v4439_v18, %s4318_s19 }
 0x12c   :  { %1818 = vrot.lane.b32.xlu1 %v4435_v17, %s4318_s19 }
 0x15d   :  { %v353_v27 = vpop.permute.xlu0 %352 }
 0x161   :  { %v355_v31 = vpop.permute.xlu0 %354 }
 0x162   :  { %v363_v34 = vsel %vm360_vm6, %v353_v27, %v355_v31  ;;  %v359_v35 = vpop.permute.xlu1 %358 }
 0x163   :  { %v374_v37 = vsel %vm328_vm7, %v363_v34, 0.0  ;;  %v364_v38 = vsel %vm360_vm6, %v359_v35, %v353_v27  ;;  %v3618_v27 = vld [vmem:[%s5414_s2 + $0x8] sm:$0xf] }
 0x164   :  { %v373_v41 = vsel %vm327_vm8, %v364_v38, 0.0  ;;  %3606 = vmatprep.subr.msk.mxu1 %vm133_vm0, %v374_v37 }
 0x165   :  { %v315_v42 = vpop.permute.xlu0 %314  ;;  %3607 = vmatpush1.msk.msra.mxu1 %vm133_vm0, %v373_v41 }
 0x166   :  { %v357_v44 = vpop.permute.xlu1 %356  ;;  %3608 = vmatmul.mubr.msk.f32.vlgmr.msra.gmra.mrb[4].mxu1 %vm129_vm1, %v3605_v39 }
 0x167   :  { %v361_v47 = vsel %vm360_vm6, %v357_v44, %v359_v35  ;;  %v362_v48 = vsel %vm360_vm6, %v355_v31, %v357_v44  ;;  %529 = vmatprep.mubr.f32.mxu1 %v4310_v2  ;;  %vm4591_vm6 = vcmp.lt.s32.totalorder %v303_v36, 15 }
 0x168   :  { %v375_v50 = vsel %vm329_vm9, %v362_v48, 0.0  ;;  %v376_v51 = vsel %vm5425_vm10, %v361_v47, 0.0  ;;  %vm4613_vm10 = vcmp.lt.s32.totalorder %v304_v43, 15  ;;  %v3625_v43 = vld [vmem:[%s5414_s2 + $0xc] sm:$0xf] }
 0x169   :  { %v321_v52 = vpop.permute.xlu0 %320  ;;  %3609 = vmatprep.subr.msk.mxu1 %vm133_vm0, %v376_v51 }
 0x16a   :  { %v326_v56 = vsel %vm322_vm12, %v321_v52, %v315_v42  ;;  %3610 = vmatpush1.msk.msra.mxu1 %vm133_vm0, %v375_v50  ;;  %v317_v57 = vpop.permute.xlu1 %316 }
 0x16b   :  { %v325_v59 = vsel %vm322_vm12, %v315_v42, %v317_v57  ;;  %3611 = vmatmul.mubr.msk.f32.vlgmr.msra.gmra.mrb[6].mxu1 %vm129_vm1, %v3605_v39  ;;  %v347_v63 = vsel %vm4555_vm2, %v326_v56, 0.0  ;;  %vm4601_vm2 = vcmp.lt.s32.totalorder %v302_v40, 15 }
 0x16c   :  { %v348_v60 = vsel %vm4543_vm14, %v325_v59, 0.0  ;;  %615 = vmatprep.mubr.f32.mxu1 %v4310_v2  ;;  %vm701_vm14 = vcmp.lt.s32.totalorder %v4478_v20, 15 }
 0x16d   :  { %v694_v4 = vpop.permute.xlu0 %693  ;;  %3612 = vmatprep.subr.msk.mxu1 %vm133_vm0, %v348_v60 }
 0x16e   :  { %3613 = vmatpush1.msk.msra.mxu1 %vm133_vm0, %v347_v63  ;;  %v319_v6 = vpop.permute.xlu1 %318 }
 0x16f   :  { %v323_v8 = vsel %vm322_vm12, %v319_v6, %v321_v52  ;;  %v324_v9 = vsel %vm322_vm12, %v317_v57, %v319_v6  ;;  %3614 = vmatmul.mubr.msk.f32.vlgmr.msra.gmra.mrb[4].mxu1 %vm129_vm1, %v351_v62  ;;  %vm711_vm12 = vmand %vm328_vm7, %vm4591_vm6  ;;  %v3632_v57 = vld [vmem:[%s5414_s2 + $0x10] sm:$0xf] }
 0x170   :  { %v349_v12 = vsel %vm4576_vm4, %v324_v9, 0.0  ;;  %v350_v13 = vsel %vm338_vm5, %v323_v8, 0.0  ;;  %686 = vmatprep.mubr.f32.mxu1 %v4310_v2  ;;  %vm710_vm4 = vmand %vm327_vm8, %vm4601_vm2  ;;  %vm4624_vm5 = vcmp.lt.s32.totalorder %v305_v46, 15  ;;  %vm5450_vm8 = vcmp.ge.s32.totalorder %v4499_v33, 1 }
 0x171   :  { %v700_v14 = vpop.permute.xlu0 %699  ;;  %3615 = vmatprep.subr.msk.mxu1 %vm133_vm0, %v350_v13  ;;  %vm4635_vm7 = vmand %vm329_vm9, %vm4613_vm10  ;;  %vm897_vm9 = vcmp.lt.s32.totalorder %v4478_v20, 1  ;;  %v3639_v13 = vld [vmem:[%s5414_s2 + $0x14] sm:$0xf] }
 0x172   :  { %v705_v19 = vsel %vm701_vm14, %v700_v14, %v694_v4  ;;  %3616 = vmatpush1.msk.msra.mxu1 %vm133_vm0, %v349_v12  ;;  %v696_v21 = vpop.permute.xlu1 %695 }
 0x173   :  { %3617 = vmatmul.mubr.msk.f32.vlgmr.msra.gmra.mrb[6].mxu1 %vm129_vm1, %v351_v62  ;;  %v704_v23 = vsel %vm701_vm14, %v694_v4, %v696_v21  ;;  %v722_v30 = vsel %vm710_vm4, %v705_v19, 0.0  ;;  %vm1442_vm4 = vcmp.lt.s32.totalorder %v4488_v26, 15 }
 0x174   :  { %v723_v24 = vsel %vm711_vm12, %v704_v23, 0.0  ;;  %878 = vmatprep.mubr.f32.mxu1 %v4310_v2  ;;  %vm713_vm12 = vmand %vm5450_vm8, %vm4624_vm5  ;;  %vm1441_vm8 = vcmp.lt.s32.totalorder %v4490_v28, 15 }
 0x175   :  { %v890_v29 = vpop.permute.xlu0 %889  ;;  %3619 = vmatprep.subr.msk.mxu0 %vm133_vm0, %v723_v24 }
 0x176   :  { %3620 = vmatpush1.msk.msra.mxu0 %vm133_vm0, %v722_v30  ;;  %v698_v31 = vpop.permute.xlu1 %697 }
 0x177   :  { %v702_v34 = vsel %vm701_vm14, %v698_v31, %v700_v14  ;;  %v703_v35 = vsel %vm701_vm14, %v696_v21, %v698_v31  ;;  %3621 = vmatmul.mubr.msk.f32.vlgmr.msra.gmra.mrb[0].mxu0 %vm129_vm1, %v3618_v27  ;;  %vm1248_vm14 = vcmp.lt.s32.totalorder %v4478_v20, 127  ;;  %v3646_v31 = vld [vmem:[%s5414_s2 + $0x18] sm:$0xf] }
 0x178   :  { %v724_v36 = vsel %vm4635_vm7, %v703_v35, 0.0  ;;  %v725_v37 = vsel %vm713_vm12, %v702_v34, 0.0  ;;  %995 = vmatprep.mubr.f32.mxu0 %v4310_v2  ;;  %vm1436_vm7 = vcmp.lt.s32.totalorder %v4478_v20, 113  ;;  %vm1446_vm12 = vmand %vm1442_vm4, %vm4519_vm11 }
 0x179   :  { %v896_v38 = vpop.permute.xlu0 %895  ;;  %3622 = vmatprep.subr.msk.mxu1 %vm133_vm0, %v725_v37 }
 0x17a   :  { %v901_v39 = vsel %vm897_vm9, %v896_v38, %v890_v29  ;;  %3623 = vmatpush1.msk.msra.mxu1 %vm133_vm0, %v724_v36  ;;  %v892_v40 = vpop.permute.xlu1 %891 }
 0x17b   :  { %v900_v41 = vsel %vm897_vm9, %v890_v29, %v892_v40  ;;  %3624 = vmatmul.mubr.msk.f32.vlgmr.msra.gmra.mrb[6].mxu1 %vm129_vm1, %v3618_v27  ;;  %v910_v44 = vsel %vm4529_vm13, %v901_v39, 0.0 }
 0x17c   :  { %v911_v42 = vsel %vm4519_vm11, %v900_v41, 0.0  ;;  %1066 = vmatprep.mubr.f32.mxu1 %v4310_v2  ;;  %vm1443_vm11 = vcmp.lt.s32.totalorder %v4497_v32, 15  ;;  %v3660_v32 = vld [vmem:[%s5414_s2 + $0x20] sm:$0xf] }
 0x17d   :  { %v1243_v46 = vpop.permute.xlu0 %1242  ;;  %3626 = vmatprep.subr.msk.mxu0 %vm133_vm0, %v911_v42 }
 0x17e   :  { %3627 = vmatpush1.msk.msra.mxu0 %vm133_vm0, %v910_v44  ;;  %v894_v47 = vpop.permute.xlu1 %893  ;;  %v84_v44 = vld [vmem:[%s5417_s5 + $0xc8] sm:$0xff] }
 0x17f   :  { %v898_v48 = vsel %vm897_vm9, %v894_v47, %v896_v38  ;;  %v899_v50 = vsel %vm897_vm9, %v892_v40, %v894_v47  ;;  %3628 = vmatmul.mubr.msk.f32.vlgmr.msra.gmra.mrb[0].mxu0 %vm129_vm1, %v3625_v43  ;;  %3633 = vmatprep.subr.msk.mxu0 %vm133_vm0, %v4433_v15  ;;  %vm1444_vm9 = vcmp.lt.s32.totalorder %v4499_v33, 15 }
 0x180   :  { %v912_v51 = vsel %vm4547_vm15, %v899_v50, 0.0  ;;  %v913_v52 = vsel %vm4562_vm3, %v898_v48, 0.0  ;;  %3634 = vmatpush1.msk.msra.mxu0 %vm133_vm0, %v4430_v10  ;;  %1158 = vmatprep.mubr.f32.mxu0 %v4310_v2  ;;  %v76_v50 = vld [vmem:[%s5417_s5 + $0x88] sm:$0xff] }
 0x181   :  { %v1241_v53 = vpop.permute.xlu0 %1240  ;;  %3629 = vmatprep.subr.msk.mxu1 %vm133_vm0, %v913_v52  ;;  %v4855_v52 = vpack.c.bf16 %v76_v50, %v75_v16  ;;  %v85_v16 = vld [vmem:[%s5417_s5 + $0xd0] sm:$0xff]  ;;  %v86_v50 = vld [vmem:[%s5417_s5 + $0xd8] sm:$0xff] }
 0x182   :  { %3630 = vmatpush1.msk.msra.mxu1 %vm133_vm0, %v912_v51  ;;  %v1245_v55 = vpop.permute.xlu1 %1244  ;;  %v1251_v10 = vsel %vm1248_vm14, %v1241_v53, %v1243_v46  ;;  %v59_v51 = vld [vmem:[%s5417_s5] sm:$0xff] }
 0x183   :  { %v1250_v15 = vsel %vm1248_vm14, %v1243_v46, %v1245_v55  ;;  %3631 = vmatmul.mubr.msk.f32.vlgmr.msra.gmra.mrb[6].mxu1 %vm129_vm1, %v3625_v43  ;;  %3636 = vmatprep.subr.msk.mxu1 %vm133_vm0, %v4435_v17  ;;  %v1261_v17 = vsel %vm4601_vm2, %v1251_v10, 0.0  ;;  %v3653_v46 = vld [vmem:[%s5414_s2 + $0x1c] sm:$0xf] }
 0x184   :  { %v1262_v56 = vsel %vm4591_vm6, %v1250_v15, 0.0  ;;  %3637 = vmatpush1.msk.msra.mxu1 %vm133_vm0, %v4439_v18  ;;  %1229 = vmatprep.mubr.f32.mxu1 %v4310_v2  ;;  %v108_v15 = vld [vmem:[%s5417_s5 + $0x188] sm:$0xff] }
 0x185   :  { %v1431_v59 = vpop.permute.xlu0 %1430  ;;  %3640 = vmatprep.subr.msk.mxu0 %vm133_vm0, %v1262_v56 }
 0x186   :  { %v1247_v60 = vpop.permute.xlu1 %1246 }
 0x187   :  { %v1252_v61 = vsel %vm1248_vm14, %v1247_v60, %v1241_v53  ;;  %3635 = vmatmul.mubr.msk.f32.vlgmr.msra.gmra.mrb[0].mxu0 %vm129_vm1, %v3632_v57  ;;  %v1249_v18 = vsel %vm1248_vm14, %v1245_v55, %v1247_v60  ;;  %vm4737_vm14 = vmand %vm1441_vm8, %vm4529_vm13  ;;  %v60_v53 = vld [vmem:[%s5417_s5 + $0x8] sm:$0xff]  ;;  %v107_v55 = vld [vmem:[%s5417_s5 + $0x180] sm:$0xff] }
 0x188   :  { %v1264_v62 = vsel %vm4624_vm5, %v1252_v61, 0.0  ;;  %3641 = vmatpush1.msk.msra.mxu0 %vm133_vm0, %v1261_v17  ;;  %1346 = vmatprep.mubr.f32.mxu0 %v4310_v2  ;;  %v1263_v6 = vsel %vm4613_vm10, %v1249_v18, 0.0  ;;  %vm1448_vm13 = vmand %vm1444_vm9, %vm4562_vm3  ;;  %vm1632_vm3 = vcmp.lt.s32.totalorder %v4478_v20, 112  ;;  %v4866_v10 = vpack.c.bf16 %v60_v53, %v59_v51  ;;  %v77_v60 = vld [vmem:[%s5417_s5 + $0x90] sm:$0xff]  ;;  %v78_v61 = vld [vmem:[%s5417_s5 + $0x98] sm:$0xff] }
 0x189   :  { %v1429_v63 = vpop.permute.xlu0 %1428  ;;  %3643 = vmatprep.subr.msk.mxu1 %vm133_vm0, %v1264_v62  ;;  %v4868_v56 = vpack.c.bf16 %v108_v15, %v107_v55  ;;  %v61_v18 = vld [vmem:[%s5417_s5 + $0x10] sm:$0xff]  ;;  %v62_v62 = vld [vmem:[%s5417_s5 + $0x18] sm:$0xff] }
 0x18a   :  { %v1433_v4 = vpop.permute.xlu1 %1432  ;;  %v1439_v9 = vsel %vm1436_vm7, %v1429_v63, %v1431_v59  ;;  %v117_v51 = vld [vmem:[%s5417_s5 + $0x1d0] sm:$0xff]  ;;  %v118_v53 = vld [vmem:[%s5417_s5 + $0x1d8] sm:$0xff] }
 0x18b   :  { %v1438_v8 = vsel %vm1436_vm7, %v1431_v59, %v1433_v4  ;;  %3638 = vmatmul.mubr.msk.f32.vlgmr.msra.gmra.mrb[6].mxu1 %vm129_vm1, %v3632_v57  ;;  %v1457_v19 = vsel %vm4737_vm14, %v1439_v9, 0.0  ;;  %vm4808_vm14 = vmand %vm1441_vm8, %vm4601_vm2  ;;  %v91_v57 = vld [vmem:[%s5417_s5 + $0x100] sm:$0xff]  ;;  %v92_v59 = vld [vmem:[%s5417_s5 + $0x108] sm:$0xff] }
 0x18c   :  { %v1458_v12 = vsel %vm1446_vm12, %v1438_v8, 0.0  ;;  %3644 = vmatpush1.msk.msra.mxu1 %vm133_vm0, %v1263_v6  ;;  %1417 = vmatprep.mubr.f32.mxu1 %v4310_v2  ;;  %vm1447_vm12 = vmand %vm1443_vm11, %vm4547_vm15  ;;  %vm1820_vm15 = vcmp.lt.s32.totalorder %v4478_v20, 111  ;;  %v4880_v17 = vpack.c.bf16 %v92_v59, %v91_v57  ;;  %v109_v6 = vld [vmem:[%s5417_s5 + $0x190] sm:$0xff]  ;;  %v110_v8 = vld [vmem:[%s5417_s5 + $0x198] sm:$0xff]  ;;  %v5035_v57 = vpack.c.bf16 %v86_v50, %v85_v16 }
 0x18d   :  { %v1627_v14 = vpop.permute.xlu0 %1626  ;;  %3647 = vmatprep.subr.msk.mxu0 %vm133_vm0, %v1458_v12  ;;  %vm1827_vm2 = vmand %vm1443_vm11, %vm4613_vm10  ;;  %v4907_v9 = vpack.c.bf16 %v110_v8, %v109_v6  ;;  %v94_v12 = vld [vmem:[%s5417_s5 + $0x118] sm:$0xff]  ;;  %v69_v59 = vld [vmem:[%s5417_s5 + $0x50] sm:$0xff]  ;;  %v2008_v50 = vstv %s3598_s26 }
 0x18e   :  { %v1435_v49 = vpop.permute.xlu1 %1434 }
 0x18f   :  { %v1440_v21 = vsel %vm1436_vm7, %v1435_v49, %v1429_v63  ;;  %3642 = vmatmul.mubr.msk.f32.vlgmr.msra.gmra.mrb[0].mxu0 %vm129_vm1, %v3639_v13  ;;  %v1437_v58 = vsel %vm1436_vm7, %v1433_v4, %v1435_v49  ;;  %vm1826_vm7 = vmand %vm1442_vm4, %vm4591_vm6  ;;  %v4893_v63 = vpack.c.bf16 %v78_v61, %v77_v60  ;;  %v4895_v4 = vpack.c.bf16 %v62_v62, %v61_v18  ;;  %v70_v60 = vld [vmem:[%s5417_s5 + $0x58] sm:$0xff]  ;;  %v101_v18 = vld [vmem:[%s5417_s5 + $0x150] sm:$0xff] }
 0x190   :  { %v1460_v23 = vsel %vm1448_vm13, %v1440_v21, 0.0  ;;  %3648 = vmatpush1.msk.msra.mxu0 %vm133_vm0, %v1457_v19  ;;  %1542 = vmatprep.mubr.f32.mxu0 %v4310_v2  ;;  %v1459_v27 = vsel %vm1447_vm12, %v1437_v58, 0.0  ;;  %vm1828_vm6 = vmand %vm1444_vm9, %vm4624_vm5  ;;  %v4919_v49 = vpack.c.bf16 %v94_v12, %v93_v45  ;;  %v63_v21 = vld [vmem:[%s5417_s5 + $0x20] sm:$0xff]  ;;  %v64_v58 = vld [vmem:[%s5417_s5 + $0x28] sm:$0xff]  ;;  %v5044_v61 = vpack.c.bf16 %v118_v53, %v117_v51 }
 0x191   :  { %v1625_v24 = vpop.permute.xlu0 %1624  ;;  %3650 = vmatprep.subr.msk.mxu1 %vm133_vm0, %v1460_v23  ;;  %v111_v23 = vld [vmem:[%s5417_s5 + $0x1a0] sm:$0xff]  ;;  %v102_v62 = vld [vmem:[%s5417_s5 + $0x158] sm:$0xff]  ;;  %v5053_v6 = vpack.c.bf16 %v70_v60, %v69_v59  ;;  %v88_v12 = vld [vmem:[%s5417_s5 + $0xe8] sm:$0xff] }
 0x192   :  { %v1629_v25 = vpop.permute.xlu1 %1628  ;;  %v1635_v29 = vsel %vm1632_vm3, %v1625_v24, %v1627_v14  ;;  %v5057_v8 = vpack.c.bf16 %v102_v62, %v101_v18  ;;  %v87_v45 = vld [vmem:[%s5417_s5 + $0xe0] sm:$0xff] }
 0x193   :  { %v1634_v54 = vsel %vm1632_vm3, %v1627_v14, %v1629_v25  ;;  %3645 = vmatmul.mubr.msk.f32.vlgmr.msra.gmra.mrb[6].mxu1 %vm129_vm1, %v3639_v13  ;;  %v1645_v36 = vsel %vm1441_vm8, %v1635_v29, 0.0  ;;  %v79_v13 = vld [vmem:[%s5417_s5 + $0xa0] sm:$0xff]  ;;  %v80_v14 = vld [vmem:[%s5417_s5 + $0xa8] sm:$0xff] }
 0x194   :  { %v1646_v30 = vsel %vm1442_vm4, %v1634_v54, 0.0  ;;  %3651 = vmatpush1.msk.msra.mxu1 %vm133_vm0, %v1459_v27  ;;  %1613 = vmatprep.mubr.f32.mxu1 %v4310_v2  ;;  %v4921_v19 = vpack.c.bf16 %v80_v14, %v79_v13  ;;  %v96_v27 = vld [vmem:[%s5417_s5 + $0x128] sm:$0xff]  ;;  %v4943_v54 = vpack.c.bf16 %v64_v58, %v63_v21  ;;  %v5068_v13 = vpack.c.bf16 %v88_v12, %v87_v45  ;;  %v71_v14 = vld [vmem:[%s5417_s5 + $0x60] sm:$0xff] }
 0x195   :  { %v1815_v34 = vpop.permute.xlu0 %1814  ;;  %3654 = vmatprep.subr.msk.mxu0 %vm133_vm0, %v1646_v30  ;;  %v81_v30 = vld [vmem:[%s5417_s5 + $0xb0] sm:$0xff]  ;;  %v72_v21 = vld [vmem:[%s5417_s5 + $0x68] sm:$0xff]  ;;  %v119_v58 = vld [vmem:[%s5417_s5 + $0x1e0] sm:$0xff] }
 0x196   :  { %v1631_v35 = vpop.permute.xlu1 %1630 }
 0x197   :  { %v1636_v37 = vsel %vm1632_vm3, %v1631_v35, %v1625_v24  ;;  %3649 = vmatmul.mubr.msk.f32.vlgmr.msra.gmra.mrb[0].mxu0 %vm129_vm1, %v3646_v31  ;;  %v1633_v38 = vsel %vm1632_vm3, %v1629_v25, %v1631_v35  ;;  %v112_v24 = vld [vmem:[%s5417_s5 + $0x1a8] sm:$0xff]  ;;  %v95_v25 = vld [vmem:[%s5417_s5 + $0x120] sm:$0xff] }
 0x198   :  { %v1648_v39 = vsel %vm1444_vm9, %v1636_v37, 0.0  ;;  %3655 = vmatpush1.msk.msra.mxu0 %vm133_vm0, %v1645_v36  ;;  %1730 = vmatprep.mubr.f32.mxu0 %v4310_v2  ;;  %v1647_v42 = vsel %vm1443_vm11, %v1633_v38, 0.0  ;;  %v4945_v29 = vpack.c.bf16 %v112_v24, %v111_v23  ;;  %v4958_v35 = vpack.c.bf16 %v96_v27, %v95_v25  ;;  %v66_v37 = vld [vmem:[%s5417_s5 + $0x38] sm:$0xff]  ;;  %v113_v38 = vld [vmem:[%s5417_s5 + $0x1b0] sm:$0xff]  ;;  %v120_v24 = vld [vmem:[%s5417_s5 + $0x1e8] sm:$0xff] }
 0x199   :  { %v1813_v40 = vpop.permute.xlu0 %1812  ;;  %3657 = vmatprep.subr.msk.mxu1 %vm133_vm0, %v1648_v39  ;;  %v114_v39 = vld [vmem:[%s5417_s5 + $0x1b8] sm:$0xff]  ;;  %v5079_v23 = vpack.c.bf16 %v72_v21, %v71_v14  ;;  %v103_v25 = vld [vmem:[%s5417_s5 + $0x160] sm:$0xff]  ;;  %v104_v27 = vld [vmem:[%s5417_s5 + $0x168] sm:$0xff]  ;;  %vm4319_vm9 = vmmov 0   ;;  %vm2474_vm11 = vcmask 64512  }
 0x19a   :  { %v1817_v41 = vpop.permute.xlu1 %1816  ;;  %v1823_v26 = vsel %vm1820_vm15, %v1813_v40, %v1815_v34 }
 0x19b   :  { %v1822_v43 = vsel %vm1820_vm15, %v1815_v34, %v1817_v41  ;;  %3652 = vmatmul.mubr.msk.f32.vlgmr.msra.gmra.mrb[6].mxu1 %vm129_vm1, %v3646_v31  ;;  %v1837_v11 = vsel %vm4808_vm14, %v1823_v26, 0.0  ;;  %v82_v31 = vld [vmem:[%s5417_s5 + $0xb8] sm:$0xff]  ;;  %v65_v34 = vld [vmem:[%s5417_s5 + $0x30] sm:$0xff] }
 0x19c   :  { %v1838_v7 = vsel %vm1826_vm7, %v1822_v43, 0.0  ;;  %3658 = vmatpush1.msk.msra.mxu1 %vm133_vm0, %v1647_v42  ;;  %1801 = vmatprep.mubr.f32.mxu1 %v4310_v2  ;;  %v4960_v36 = vpack.c.bf16 %v82_v31, %v81_v30  ;;  %v98_v42 = vld [vmem:[%s5417_s5 + $0x138] sm:$0xff]  ;;  %v83_v43 = vld [vmem:[%s5417_s5 + $0xc0] sm:$0xff]  ;;  %v4987_v26 = vpack.c.bf16 %v66_v37, %v65_v34  ;;  %v5091_v30 = vpack.c.bf16 %v120_v24, %v119_v58  ;;  %v89_v34 = vld [vmem:[%s5417_s5 + $0xf0] sm:$0xff] }
 0x19d   :  { %3661 = vmatprep.subr.msk.mxu0 %vm133_vm0, %v1838_v7  ;;  %v115_v7 = vld [vmem:[%s5417_s5 + $0x1c0] sm:$0xff]  ;;  %v5093_v31 = vpack.c.bf16 %v104_v27, %v103_v25  ;;  %v90_v37 = vld [vmem:[%s5417_s5 + $0xf8] sm:$0xff] }
 0x19e   :  { %v1819_v28 = vpop.permute.xlu1 %1818  ;;  %v2459_v25 = vld [vmem:[%s5422_s10 + $0x18] sm:$0xff] }
 0x19f   :  { %v1824_v47 = vsel %vm1820_vm15, %v1819_v28, %v1813_v40  ;;  %3656 = vmatmul.mubr.msk.f32.vlgmr.msra.gmra.mrb[0].mxu0 %vm129_vm1, %v3653_v46  ;;  %v1821_v22 = vsel %vm1820_vm15, %v1817_v41, %v1819_v28  ;;  %v4972_v40 = vpack.c.bf16 %v114_v39, %v113_v38  ;;  %v97_v41 = vld [vmem:[%s5417_s5 + $0x130] sm:$0xff]  ;;  %v5103_v38 = vpack.c.bf16 %v90_v37, %v89_v34 }
 0x1a0   :  { %v1840_v48 = vsel %vm1828_vm6, %v1824_v47, 0.0  ;;  %3662 = vmatpush1.msk.msra.mxu0 %vm133_vm0, %v1837_v11  ;;  %1922 = vmatprep.mubr.f32.mxu0 %v4310_v2  ;;  %v1839_v33 = vsel %vm1827_vm2, %v1821_v22, 0.0  ;;  %v4997_v28 = vpack.c.bf16 %v98_v42, %v97_v41  ;;  %v4999_v11 = vpack.c.bf16 %v84_v44, %v83_v43  ;;  %v67_v47 = vld [vmem:[%s5417_s5 + $0x40] sm:$0xff]  ;;  %v68_v22 = vld [vmem:[%s5417_s5 + $0x48] sm:$0xff]  ;;  %v73_v39 = vld [vmem:[%s5417_s5 + $0x70] sm:$0xff] }
 0x1a1   :  { %3664 = vmatprep.subr.msk.mxu1 %vm133_vm0, %v1840_v48  ;;  %4048 = vmatprep.subr.bf16.mxu0 %v4855_v52  ;;  %v99_v48 = vld [vmem:[%s5417_s5 + $0x140] sm:$0xff]  ;;  %v5029_v55 = vpack.c.bf16 %v68_v22, %v67_v47  ;;  %v74_v41 = vld [vmem:[%s5417_s5 + $0x78] sm:$0xff]  ;;  %v121_v42 = vld [vmem:[%s5417_s5 + $0x1f0] sm:$0xff] }
 0x1a2   :  { %v5115_v43 = vpack.c.bf16 %v74_v41, %v73_v39  ;;  %v122_v44 = vld [vmem:[%s5417_s5 + $0x1f8] sm:$0xff]  ;;  %v2462_v37 = vld [vmem:[%s5422_s10 + $0x30] sm:$0xff]  ;;  %v2464_v41 = vld [vmem:[%s5422_s10 + $0x40] sm:$0xff] }
 0x1a3   :  { %3659 = vmatmul.mubr.msk.f32.vlgmr.msra.gmra.mrb[6].mxu1 %vm129_vm1, %v3653_v46  ;;  %v116_v46 = vld [vmem:[%s5417_s5 + $0x1c8] sm:$0xff]  ;;  %v4107_v47 = vpack.c.bf16 %v122_v44, %v121_v42  ;;  %v2466_v44 = vld [vmem:[%s5422_s10 + $0x50] sm:$0xff] }
 0x1a4   :  { %3665 = vmatpush1.msk.msra.mxu1 %vm133_vm0, %v1839_v33  ;;  %1993 = vmatprep.mubr.f32.mxu1 %v4310_v2  ;;  %v5011_v33 = vpack.c.bf16 %v116_v46, %v115_v7  ;;  %v105_v7 = vld [vmem:[%s5417_s5 + $0x170] sm:$0xff]  ;;  %v106_v46 = vld [vmem:[%s5417_s5 + $0x178] sm:$0xff]  ;;  %v2465_v42 = vld [vmem:[%s5422_s10 + $0x48] sm:$0xff] }
 0x1a5   :  { %4080 = vmatprep.subr.bf16.mxu1 %v4868_v56  ;;  %v5127_v22 = vpack.c.bf16 %v106_v46, %v105_v7  ;;  %v2467_v7 = vld [vmem:[%s5422_s10 + $0x58] sm:$0xff] }
 0x1a6   :  { %v5265_v46 = vpack.c.bf16 %v2467_v7, %v2466_v44 }
 0x1a7   :  { %3663 = vmatmul.mubr.msk.f32.vlgmr.msra.gmra.mrb[0].mxu0 %vm129_vm1, %v3660_v32 }
 0x1a8   :  { %4050 = vmatpush3.bf16.msra.mxu0 %v4866_v10 }
 0x1a9   :  { %4052 = vmatprep.subr.bf16.mxu0 %v4893_v63 }
 0x1ab   :  { %3666 = vmatmul.mubr.msk.f32.vlgmr.msra.gmra.mrb[6].mxu1 %vm129_vm1, %v3660_v32  ;;  %v100_v32 = vld [vmem:[%s5417_s5 + $0x148] sm:$0xff] }
 0x1ac   :  { %4082 = vmatpush3.bf16.msra.mxu1 %v4880_v17  ;;  %4054 = vmatpush3.bf16.msra.mxu0 %v4895_v4  ;;  %v5033_v15 = vpack.c.bf16 %v100_v32, %v99_v48 }
 0x1ad   :  { %4084 = vmatprep.subr.bf16.mxu1 %v4907_v9  ;;  %4056 = vmatprep.subr.bf16.mxu0 %v4921_v19 }
 0x1b0   :  { %4086 = vmatpush3.bf16.msra.mxu1 %v4919_v49  ;;  %4058 = vmatpush3.bf16.msra.mxu0 %v4943_v54 }
 0x1b1   :  { %4088 = vmatprep.subr.bf16.mxu1 %v4945_v29  ;;  %4060 = vmatprep.subr.bf16.mxu0 %v4960_v36 }
 0x1b4   :  { %4090 = vmatpush3.bf16.msra.mxu1 %v4958_v35  ;;  %4062 = vmatpush3.bf16.msra.mxu0 %v4987_v26 }
 0x1b5   :  { %4092 = vmatprep.subr.bf16.mxu1 %v4972_v40  ;;  %4064 = vmatprep.subr.bf16.mxu0 %v4999_v11 }
 0x1b8   :  { %4094 = vmatpush3.bf16.msra.mxu1 %v4997_v28  ;;  %4066 = vmatpush3.bf16.msra.mxu0 %v5029_v55 }
 0x1b9   :  { %4096 = vmatprep.subr.bf16.mxu1 %v5011_v33  ;;  %4068 = vmatprep.subr.bf16.mxu0 %v5035_v57 }
 0x1bc   :  { %4098 = vmatpush3.bf16.msra.mxu1 %v5033_v15  ;;  %4070 = vmatpush3.bf16.msra.mxu0 %v5053_v6 }
 0x1bd   :  { %4100 = vmatprep.subr.bf16.mxu1 %v5044_v61  ;;  %4072 = vmatprep.subr.bf16.mxu0 %v5068_v13 }
 0x1c0   :  { %4102 = vmatpush3.bf16.msra.mxu1 %v5057_v8  ;;  %4074 = vmatpush3.bf16.msra.mxu0 %v5079_v23 }
 0x1c1   :  { %4104 = vmatprep.subr.bf16.mxu1 %v5091_v30  ;;  %4076 = vmatprep.subr.bf16.mxu0 %v5103_v38 }
 0x1c4   :  { %4106 = vmatpush3.bf16.msra.mxu1 %v5093_v31  ;;  %4078 = vmatpush3.bf16.msra.mxu0 %v5115_v43 }
 0x1c5   :  { %4108 = vmatprep.subr.bf16.mxu1 %v4107_v47  ;;  %4112 = vmatprep.subr.bf16.mxu0 %v4855_v52 }
 0x1c8   :  { %4110 = vmatpush3.bf16.msra.mxu1 %v5127_v22 }
 0x1c9   :  { %4144 = vmatprep.subr.bf16.mxu1 %v4868_v56 }
 0x242   :  { %v617_v48 = vpop.f32.mrb[4].mxu1 }
 0x243   :  { %v619_v32 = vpop.f32.mrb[5].mxu1 }
 0x27a   :  { %v1924_v16 = vpop.f32.mrb[0].mxu0 }
 0x27b   :  { %v4223_v51 = vadd.f32 %v1924_v16, %v617_v48  ;;  %v1926_v53 = vpop.f32.mrb[1].mxu0 }
 0x27c   :  { %v4224_v59 = vadd.f32 %v1926_v53, %v619_v32  ;;  %v2553_v32 = vshra.s32 %v4478_v20, 3  ;;  %v3674_v53 = vld [vmem:[%s5419_s7 + $0x8] sm:$0xff] }
 0x27d   :  { %v2009_v60 = vmul.f32 %v4223_v51, %v2008_v50  ;;  %vm2004_vm10 = vcmp.ge.f32.partialorder %v4223_v51, 0.0 }
 0x27e   :  { %v2010_v18 = vmul.f32 %v4224_v59, %v2008_v50  ;;  %v1995_v62 = vpop.f32.mrb[6].mxu1  ;;  %vm2005_vm5 = vcmp.ge.f32.partialorder %v4224_v59, 0.0  ;;  %v2554_v16 = vand.u32 7, %v2553_v32 }
 0x27f   :  { %v2011_v45 = vmul.f32 %v2008_v50, %v1995_v62  ;;  %v1997_v12 = vpop.f32.mrb[7].mxu1  ;;  %vm2006_vm4 = vcmp.ge.f32.partialorder %v1995_v62, 0.0  ;;  %v2013_v56 = vsel %vm2004_vm10, %v4223_v51, %v2009_v60  ;;  %vm3590_vm10 = vcmask 261120  }
 0x280   :  { %vm2007_vm8 = vcmp.ge.f32.partialorder %v1997_v12, 0.0  ;;  %v2012_v52 = vmul.f32 %v2008_v50, %v1997_v12  ;;  %v2014_v14 = vsel %vm2005_vm5, %v4224_v59, %v2010_v18  ;;  %v2552_v50 = vand.u32 7, %v4478_v20  ;;  %v2563_v18 = vld [vmem:[%s5419_s7] sm:$0xff] }
 0x281   :  { %2081 = vmatprep.mubr.f32.mxu0 %v2014_v14  ;;  %v2015_v58 = vsel %vm2006_vm4, %v1995_v62, %v2011_v45  ;;  %v3679_v45 = vld [vmem:[%s5419_s7 + $0x10] sm:$0xff]  ;;  %v3685_v14 = vld [vmem:[%s5419_s7 + $0x20] sm:$0xff]  ;;  %vm3040_vm7 = vcmp.lt.s32.totalorder %v2554_v16, 7 }
 0x282   :  { %2082 = vmatmul.mubr.f32.vlgmr.msra.gmra.mrb[2].mxu0 %v2013_v56  ;;  %v2016_v21 = vsel %vm2007_vm8, %v1997_v12, %v2012_v52  ;;  %vm5282_vm13 = vcmp.ge.s32.totalorder %v2552_v50, 1  ;;  %vm5296_vm3 = vcmp.lt.s32.totalorder %v2552_v50, 7  ;;  %v3682_v52 = vld [vmem:[%s5419_s7 + $0x18] sm:$0xff] }
 0x283   :  { %2151 = vmatprep.mubr.f32.mxu1 %v2016_v21  ;;  %4114 = vmatpush3.bf16.msra.mxu0 %v4866_v10  ;;  %v3687_v21 = vld [vmem:[%s5419_s7 + $0x28] sm:$0xff]  ;;  %vm3041_vm14 = vmand %vm3040_vm7, %vm5282_vm13 }
 0x284   :  { %2152 = vmatmul.mubr.f32.vlgmr.msra.gmra.mrb[8].mxu1 %v2015_v58  ;;  %4116 = vmatprep.subr.bf16.mxu0 %v4893_v63  ;;  %vm3204_vm6 = vmand %vm3040_vm7, %vm5296_vm3 }
 0x285   :  { %4146 = vmatpush3.bf16.msra.mxu1 %v4880_v17  ;;  %2223 = vmatprep.mubr.f32.mxu0 %v4402_v1 }
 0x286   :  { %4148 = vmatprep.subr.bf16.mxu1 %v4907_v9  ;;  %2293 = vmatprep.mubr.f32.mxu1 %v4416_v5 }
 0x287   :  { %4118 = vmatpush3.bf16.msra.mxu0 %v4895_v4 }
 0x288   :  { %4120 = vmatprep.subr.bf16.mxu0 %v4921_v19 }
 0x289   :  { %4150 = vmatpush3.bf16.msra.mxu1 %v4919_v49 }
 0x28a   :  { %4152 = vmatprep.subr.bf16.mxu1 %v4945_v29 }
 0x28b   :  { %4122 = vmatpush3.bf16.msra.mxu0 %v4943_v54 }
 0x28c   :  { %4124 = vmatprep.subr.bf16.mxu0 %v4960_v36  ;;  %v58_v36 = vld [vmem:[%s5416_s4] sm:$0xff] }
 0x28d   :  { %4154 = vmatpush3.bf16.msra.mxu1 %v4958_v35 }
 0x28e   :  { %4156 = vmatprep.subr.bf16.mxu1 %v4972_v40  ;;  %v57_v40 = vld [vmem:[%s5415_s3] sm:$0xff]  ;;  %s3671_s3 = sld [smem:[#allocation2 + $0x2]] }
 0x28f   :  { %4126 = vmatpush3.bf16.msra.mxu0 %v4987_v26  ;;  %v2451_v26 = vld [vmem:[%s5418_s6] sm:$0xff]  ;;  %s4320_s6 = smov 9  }
 0x290   :  { %4128 = vmatprep.subr.bf16.mxu0 %v4999_v11 }
 0x291   :  { %4158 = vmatpush3.bf16.msra.mxu1 %v4997_v28 }
 0x292   :  { %4160 = vmatprep.subr.bf16.mxu1 %v5011_v33 }
 0x293   :  { %4130 = vmatpush3.bf16.msra.mxu0 %v5029_v55 }
 0x294   :  { %4132 = vmatprep.subr.bf16.mxu0 %v5035_v57  ;;  %v2549_v33 = vstv %s3671_s3 }
 0x295   :  { %4162 = vmatpush3.bf16.msra.mxu1 %v5033_v15 }
 0x296   :  { %4164 = vmatprep.subr.bf16.mxu1 %v5044_v61 }
 0x297   :  { %4134 = vmatpush3.bf16.msra.mxu0 %v5053_v6  ;;  %v2456_v6 = vld [vmem:[%s5422_s10] sm:$0xff] }
 0x298   :  { %4136 = vmatprep.subr.bf16.mxu0 %v5068_v13  ;;  %v2458_v13 = vld [vmem:[%s5422_s10 + $0x10] sm:$0xff] }
 0x299   :  { %4166 = vmatpush3.bf16.msra.mxu1 %v5057_v8  ;;  %v2457_v8 = vld [vmem:[%s5422_s10 + $0x8] sm:$0xff]  ;;  %v5225_v27 = vpack.c.bf16 %v2459_v25, %v2458_v13 }
 0x29a   :  { %4168 = vmatprep.subr.bf16.mxu1 %v5091_v30  ;;  %v5219_v24 = vpack.c.bf16 %v2457_v8, %v2456_v6  ;;  %v2460_v30 = vld [vmem:[%s5422_s10 + $0x20] sm:$0xff] }
 0x29b   :  { %4138 = vmatpush3.bf16.msra.mxu0 %v5079_v23  ;;  %v4326_v23 = vmov 0.0|0.0  }
 0x29c   :  { %4140 = vmatprep.subr.bf16.mxu0 %v5103_v38  ;;  %v2463_v38 = vld [vmem:[%s5422_s10 + $0x38] sm:$0xff] }
 0x29d   :  { %4170 = vmatpush3.bf16.msra.mxu1 %v5093_v31  ;;  %v2461_v31 = vld [vmem:[%s5422_s10 + $0x28] sm:$0xff]  ;;  %v5245_v39 = vpack.c.bf16 %v2463_v38, %v2462_v37 }
 0x29e   :  { %4172 = vmatprep.subr.bf16.mxu1 %v4107_v47  ;;  %v5235_v34 = vpack.c.bf16 %v2461_v31, %v2460_v30  ;;  %v2468_v47 = vld [vmem:[%s5422_s10 + $0x60] sm:$0xff] }
 0x29f   :  { %4142 = vmatpush3.bf16.msra.mxu0 %v5115_v43  ;;  %v5255_v43 = vpack.c.bf16 %v2465_v42, %v2464_v41 }
 0x2a0   :  { %3907 = vmatprep.subr.mxu0 %v4310_v2 }
 0x2a1   :  { %4174 = vmatpush3.bf16.msra.mxu1 %v5127_v22  ;;  %v2469_v22 = vld [vmem:[%s5422_s10 + $0x68] sm:$0xff] }
 0x2a2   :  { %2224 = vmatmul.mubr.f32.vlgmr.msra.gmra.mrb[4].mxu0 %v4398_v0  ;;  %3917 = vmatprep.subr.mxu1 %v4310_v2  ;;  %v5275_v48 = vpack.c.bf16 %v2469_v22, %v2468_v47 }
 0x2a3   :  { %3909 = vmatprep.mubr.msk.f32.mxu0 %vm4319_vm9, %v4310_v2 }
 0x2a4   :  { %2294 = vmatmul.mubr.f32.vlgmr.msra.gmra.mrb[10].mxu1 %v4408_v3 }
 0x2a5   :  { %3919 = vmatprep.mubr.msk.f32.mxu1 %vm4319_vm9, %v4310_v2 }
 0x355   :  { %v3735_v1 = vpop.f32.mrb[2].mxu0 }
 0x356   :  { %v3736_v5 = vpop.f32.mrb[3].mxu0 }
 0x357   :  { %v3737_v10 = vadd.f32 %v3736_v5, %v3735_v1  ;;  %v3770_v17 = vpop.f32.mrb[8].mxu1  ;;  %v3690_v1 = vld [vmem:[%s5419_s7 + $0x30] sm:$0xff] }
 0x358   :  { %v3771_v63 = vpop.f32.mrb[9].mxu1 }
 0x359   :  { %v3772_v4 = vadd.f32 %v3771_v63, %v3770_v17  ;;  %v3696_v63 = vld [vmem:[%s5419_s7 + $0x40] sm:$0xff] }
 0x35b   :  { %v2154_v9 = vadd.f32 %v3772_v4, %v3737_v10  ;;  %v3693_v10 = vld [vmem:[%s5419_s7 + $0x38] sm:$0xff]  ;;  %v2470_v4 = vld [vmem:[%s5422_s10 + $0x70] sm:$0xff] }
 0x375   :  { %v3805_v49 = vpop.f32.mrb[4].mxu0 }
 0x376   :  { %v3806_v0 = vpop.f32.mrb[5].mxu0 }
 0x377   :  { %v3840_v19 = vpop.f32.mrb[10].mxu1  ;;  %v3807_v54 = vadd.f32 %v3806_v0, %v3805_v49 }
 0x378   :  { %v3841_v29 = vpop.f32.mrb[11].mxu1 }
 0x379   :  { %v3842_v3 = vadd.f32 %v3841_v29, %v3840_v19 }
 0x37b   :  { %v2296_v35 = vadd.f32 %v3842_v3, %v3807_v54 }
 0x37d   :  { %3908 = vmatpush3.msk.msra.mxu0 %vm133_vm0, %v2296_v35 }
 0x37e   :  { %3910 = vmatmul.mubr.msk.f32.vlgmr.msra.gmra.mrb[6].mxu0 %vm129_vm1, %v58_v36  ;;  %3912 = vmatprep.subr.mxu0 %v4310_v2 }
 0x37f   :  { %3913 = vmatpush3.msk.msra.mxu0 %vm133_vm0, %v2154_v9  ;;  %3914 = vmatprep.mubr.msk.f32.mxu0 %vm4319_vm9, %v4310_v2  ;;  %v2471_v9 = vld [vmem:[%s5422_s10 + $0x78] sm:$0xff] }
 0x380   :  { %4175 = vmatprep.subr.bf16.mxu0 %v4326_v23  ;;  %v4197_v49 = vpack.c.bf16 %v2471_v9, %v2470_v4 }
 0x386   :  { %3915 = vmatmul.mubr.msk.f32.vlgmr.msra.gmra.mrb[6].mxu0 %vm129_vm1, %v57_v40  ;;  %vm2557_vm1 = vcmp.ge.s32.totalorder %v2554_v16, 1 }
 0x387   :  { %3999 = vmatprep.mubr.msk.f32.mxu0 %vm4319_vm9, %v4310_v2  ;;  %4177 = vmatpush3.bf16.msra.mxu0 %v5219_v24  ;;  %vm2559_vm12 = vmand %vm2557_vm1, %vm5282_vm13 }
 0x388   :  { %4178 = vmatprep.subr.bf16.mxu0 %v4326_v23  ;;  %vm2720_vm15 = vmand %vm2557_vm1, %vm5296_vm3 }
 0x38b   :  { %4180 = vmatpush3.bf16.msra.mxu0 %v5225_v27 }
 0x38c   :  { %4181 = vmatprep.subr.bf16.mxu0 %v4326_v23 }
 0x38f   :  { %4183 = vmatpush3.bf16.msra.mxu0 %v5235_v34 }
 0x390   :  { %4184 = vmatprep.subr.bf16.mxu0 %v4326_v23 }
 0x393   :  { %4186 = vmatpush3.bf16.msra.mxu0 %v5245_v39 }
 0x394   :  { %4187 = vmatprep.subr.bf16.mxu0 %v4326_v23 }
 0x397   :  { %4189 = vmatpush3.bf16.msra.mxu0 %v5255_v43 }
 0x398   :  { %4190 = vmatprep.subr.bf16.mxu0 %v4326_v23 }
 0x39b   :  { %4192 = vmatpush3.bf16.msra.mxu0 %v5265_v46 }
 0x39c   :  { %4193 = vmatprep.subr.bf16.mxu0 %v4326_v23 }
 0x39f   :  { %4195 = vmatpush3.bf16.msra.mxu0 %v5275_v48 }
 0x3a0   :  { %4196 = vmatprep.subr.bf16.mxu0 %v4326_v23 }
 0x3a3   :  { %4198 = vmatpush3.bf16.msra.mxu0 %v4197_v49 }
 0x3a4   :  { %4199 = vmatprep.subr.bf16.mxu0 %v4326_v23 }
 0x459   :  { %v5190_v28 = vpop.f32.mrb[6].mxu0 }
 0x45a   :  { %v3916_v11 = vpop.f32.mrb[7].mxu0  ;;  %3918 = vmatpush3.msra.mxu1 %v5190_v28 }
 0x45b   :  { %3920 = vmatmul.mubr.msk.f32.vlgmr.msra.gmra.mrb[12].mxu1 %vm2474_vm11, %v2451_v26  ;;  %3922 = vmatprep.subr.mxu1 %v4310_v2  ;;  %v2455_v26 = vld [vmem:[%s5421_s9 + $0x8] sm:$0xff] }
 0x45c   :  { %3924 = vmatprep.mubr.msk.f32.mxu1 %vm4319_vm9, %v4310_v2 }
 0x52e   :  { %v2544_v55 = vpop.f32.mrb[12].mxu1 }
 0x52f   :  { %vm2548_vm0 = vcmp.ge.f32.partialorder %v2544_v55, 0.0  ;;  %v2550_v15 = vmul.f32 %v2549_v33, %v2544_v55  ;;  %v3921_v57 = vpop.f32.mrb[13].mxu1  ;;  %v2452_v33 = vld [vmem:[%s5420_s8] sm:$0xff] }
 0x531   :  { %v5197_v61 = vsel %vm2548_vm0, %v2544_v55, %v2550_v15 }
 0x532   :  { %2555 = vrot.lane.b32.xlu1 %v5197_v61, %s4320_s6  ;;  %2564 = vrot.lane.b32.xlu0 %v5197_v61, %s4321_s30 }
 0x536   :  { %2800 = vrot.lane.b32.xlu1 %v5197_v61, %s4314_s15  ;;  %2717 = vrot.lane.b32.xlu0 %v5197_v61, %s4322_s0 }
 0x53a   :  { %3038 = vrot.lane.b32.xlu1 %v5197_v61, %s4323_s1  ;;  %2957 = vrot.lane.b32.xlu0 %v5197_v61, %s4315_s16 }
 0x53e   :  { %3202 = vrot.lane.b32.xlu1 %v5197_v61, %s4324_s13  ;;  %3121 = vrot.lane.b32.xlu0 %v5197_v61, %s4325_s14  ;;  %s3672_s13 = sld [smem:[#allocation2 + $0x3]] }
 0x544   :  { %v3285_v0 = vstv %s3672_s13 }
 0x5a4   :  { %v2565_v59 = vpop.permute.xlu0 %2564  ;;  %v2556_v60 = vpop.permute.xlu1 %2555 }
 0x5a5   :  { %3923 = vmatpush3.msk.msra.mxu1 %vm2557_vm1, %v2565_v59 }
 0x5a6   :  { %3925 = vmatmul.mubr.msk.f32.vlgmr.msra.gmra.mrb[14].mxu1 %vm2474_vm11, %v3674_v53  ;;  %3927 = vmatprep.subr.mxu1 %v4310_v2 }
 0x5a7   :  { %3928 = vmatpush3.msk.msra.mxu1 %vm2559_vm12, %v2556_v60  ;;  %3929 = vmatprep.mubr.msk.f32.mxu1 %vm4319_vm9, %v4310_v2 }
 0x5a8   :  { %3932 = vmatprep.subr.mxu1 %v4310_v2  ;;  %v2718_v62 = vpop.permute.xlu0 %2717  ;;  %v2801_v12 = vpop.permute.xlu1 %2800 }
 0x5ac   :  { %v2958_v56 = vpop.permute.xlu0 %2957  ;;  %v3039_v58 = vpop.permute.xlu1 %3038 }
 0x5ae   :  { %3930 = vmatmul.mubr.msk.f32.vlgmr.msra.gmra.mrb[14].mxu1 %vm2474_vm11, %v2563_v18 }
 0x5af   :  { %3933 = vmatpush3.msk.msra.mxu1 %vm2720_vm15, %v2718_v62  ;;  %3934 = vmatprep.mubr.msk.f32.mxu1 %vm4319_vm9, %v4310_v2 }
 0x5b0   :  { %3937 = vmatprep.subr.mxu1 %v4310_v2  ;;  %v3122_v5 = vpop.permute.xlu0 %3121  ;;  %v3203_v17 = vpop.permute.xlu1 %3202 }
 0x5b6   :  { %3935 = vmatmul.mubr.msk.f32.vlgmr.msra.gmra.mrb[14].mxu1 %vm2474_vm11, %v3679_v45 }
 0x5b7   :  { %3938 = vmatpush3.msk.msra.mxu1 %vm5282_vm13, %v2801_v12  ;;  %3939 = vmatprep.mubr.msk.f32.mxu1 %vm4319_vm9, %v4310_v2 }
 0x5b8   :  { %3942 = vmatprep.subr.mxu1 %v4310_v2 }
 0x5be   :  { %3940 = vmatmul.mubr.msk.f32.vlgmr.msra.gmra.mrb[14].mxu1 %vm2474_vm11, %v3682_v52 }
 0x5bf   :  { %3943 = vmatpush3.msra.mxu1 %v5197_v61  ;;  %3944 = vmatprep.mubr.msk.f32.mxu1 %vm4319_vm9, %v4310_v2 }
 0x5c0   :  { %3947 = vmatprep.subr.mxu1 %v4310_v2 }
 0x5c6   :  { %3945 = vmatmul.mubr.msk.f32.vlgmr.msra.gmra.mrb[14].mxu1 %vm2474_vm11, %v3685_v14 }
 0x5c7   :  { %3948 = vmatpush3.msk.msra.mxu1 %vm5296_vm3, %v2958_v56  ;;  %3949 = vmatprep.mubr.msk.f32.mxu1 %vm4319_vm9, %v4310_v2 }
 0x5c8   :  { %3952 = vmatprep.subr.mxu1 %v4310_v2 }
 0x5ce   :  { %3950 = vmatmul.mubr.msk.f32.vlgmr.msra.gmra.mrb[14].mxu1 %vm2474_vm11, %v3687_v21 }
 0x5cf   :  { %3953 = vmatpush3.msk.msra.mxu1 %vm3041_vm14, %v3039_v58  ;;  %3954 = vmatprep.mubr.msk.f32.mxu1 %vm4319_vm9, %v4310_v2 }
 0x5d0   :  { %3957 = vmatprep.subr.mxu1 %v4310_v2 }
 0x5d6   :  { %3955 = vmatmul.mubr.msk.f32.vlgmr.msra.gmra.mrb[14].mxu1 %vm2474_vm11, %v3690_v1 }
 0x5d7   :  { %3958 = vmatpush3.msk.msra.mxu1 %vm3040_vm7, %v3122_v5  ;;  %3959 = vmatprep.mubr.msk.f32.mxu1 %vm4319_vm9, %v4310_v2 }
 0x5d8   :  { %3962 = vmatprep.subr.mxu1 %v4310_v2 }
 0x5de   :  { %3960 = vmatmul.mubr.msk.f32.vlgmr.msra.gmra.mrb[14].mxu1 %vm2474_vm11, %v3693_v10 }
 0x5df   :  { %3963 = vmatpush3.msk.msra.mxu1 %vm3204_vm6, %v3203_v17  ;;  %3964 = vmatprep.mubr.msk.f32.mxu1 %vm4319_vm9, %v4310_v2 }
 0x5e6   :  { %3965 = vmatmul.mubr.msk.f32.vlgmr.msra.gmra.mrb[14].mxu1 %vm2474_vm11, %v3696_v63 }
 0x6b9   :  { %v3279_v19 = vpop.f32.mrb[14].mxu1 }
 0x6ba   :  { %vm3284_vm2 = vcmp.ge.f32.partialorder %v3279_v19, 0.0  ;;  %v3286_v54 = vmul.f32 %v3285_v0, %v3279_v19  ;;  %v3966_v29 = vpop.f32.mrb[15].mxu1 }
 0x6bc   :  { %v3287_v3 = vsel %vm3284_vm2, %v3279_v19, %v3286_v54 }
 0x6bd   :  { %4000 = vmatmul.mubr.f32.vlgmr.msra.gmra.mrb[8].mxu0 %v3287_v3 }
 0x6be   :  { %4201 = vmatpush3.bf16.msra.mxu0 %v5219_v24  ;;  %4034 = vmatprep.mubr.msk.f32.mxu0 %vm4319_vm9, %v4310_v2  ;;  %v2454_v2 = vld [vmem:[%s5421_s9] sm:$0xff] }
 0x6bf   :  { %4202 = vmatprep.subr.bf16.mxu0 %v4326_v23  ;;  %4039 = vmatprep.mubr.msk.f32.mxu1 %vm2474_vm11, %v2454_v2 }
 0x6c2   :  { %4204 = vmatpush3.bf16.msra.mxu0 %v5225_v27 }
 0x6c3   :  { %4205 = vmatprep.subr.bf16.mxu0 %v4326_v23 }
 0x6c6   :  { %4207 = vmatpush3.bf16.msra.mxu0 %v5235_v34 }
 0x6c7   :  { %4208 = vmatprep.subr.bf16.mxu0 %v4326_v23 }
 0x6ca   :  { %4210 = vmatpush3.bf16.msra.mxu0 %v5245_v39 }
 0x6cb   :  { %4211 = vmatprep.subr.bf16.mxu0 %v4326_v23 }
 0x6ce   :  { %4213 = vmatpush3.bf16.msra.mxu0 %v5255_v43 }
 0x6cf   :  { %4214 = vmatprep.subr.bf16.mxu0 %v4326_v23 }
 0x6d2   :  { %4216 = vmatpush3.bf16.msra.mxu0 %v5265_v46 }
 0x6d3   :  { %4217 = vmatprep.subr.bf16.mxu0 %v4326_v23 }
 0x6d6   :  { %4219 = vmatpush3.bf16.msra.mxu0 %v5275_v48 }
 0x6d7   :  { %4220 = vmatprep.subr.bf16.mxu0 %v4326_v23 }
 0x6da   :  { %4222 = vmatpush3.bf16.msra.mxu0 %v4197_v49 }
 0x6dd   :  { %4035 = vmatmul.mubr.f32.vlgmr.msra.gmra.mrb[10].mxu0 %v5190_v28  ;;  %v2453_v28 = vld [vmem:[%s5420_s8 + $0x8] sm:$0xff] }
 0x790   :  { %v3354_v35 = vpop.f32.mrb[8].mxu0 }
 0x791   :  { %v4001_v36 = vpop.f32.mrb[9].mxu0 }
 0x7b0   :  { %v3424_v40 = vpop.f32.mrb[10].mxu0 }
 0x7b1   :  { %v4036_v11 = vpop.f32.mrb[11].mxu0  ;;  %4037 = vmatprep.subr.mxu1 %v3424_v40 }
 0x7b2   :  { %4038 = vmatpush3.msra.mxu1 %v3424_v40 }
 0x7b3   :  { %4040 = vmatmul.mubr.msk.f32.vlgmr.msra.gmra.mrb[16].mxu1 %vm2474_vm11, %v2455_v26  ;;  %4042 = vmatprep.subr.mxu1 %v3354_v35 }
 0x7b4   :  { %4043 = vmatpush3.msra.mxu1 %v3354_v35  ;;  %4044 = vmatprep.mubr.msk.f32.mxu1 %vm2474_vm11, %v2452_v33 }
 0x7bb   :  { %4045 = vmatmul.mubr.msk.f32.vlgmr.msra.gmra.mrb[16].mxu1 %vm2474_vm11, %v2453_v28 }
 0x88e   :  { %v4046_v55 = vpop.f32.mrb[16].mxu1 }
 0x88f   :  { %3592 = vst.msk [vmem:[%s5424_s12 + $0x8] sm:$0xff] %vm3590_vm10, %v4046_v55  ;;  %v3581_v15 = vpop.f32.mrb[17].mxu1 }
 0x890   :  { %3591 = vst.msk [vmem:[%s5424_s12] sm:$0xff] %vm3590_vm10, %v3581_v15 }
 0x891   :  { %3597 = vsyncpa [#allocation3], 1 }

</bundles_post_ra>
